<compile_context>
chip_gen: v6e
topology: v6e:2x2x1
jax: 0.10.0
libtpu: 0.0.40
codegen_flags: <defaults>
</compile_context>

<pallas_src>
import functools

import jax
import jax.numpy as jnp
from jax.experimental import pallas as pl
from jax.experimental.pallas import tpu as pltpu


def _sed_head(feat, fc1_wT, fc1_b, att_wT, att_b, cla_wT, cla_b):
    """SED attention head for one batch element.

    feat:   (F, Hf, T) f32 backbone feature map
    fc1_wT: (F, F)  bf16 pre-transposed  (x @ fc1_wT == x @ W^T in torch)
    att_wT: (F, C)  bf16 pre-transposed 1x1-conv weight
    cla_wT: (F, C)  bf16 pre-transposed 1x1-conv weight
    returns clip (1, C), frame (C, T), maxframe (1, C) — f32
    """
    F_, _, T = feat.shape

    # mean over frequency -> (F, T), then work in (T, F): pooled axis on
    # sublanes, feature axis lane-dense for the matmuls.
    x = jnp.mean(feat, axis=1).T                               # (T, F) f32

    # time pooling, kernel=3, stride=1, pad=1 (max pads -inf, avg pads 0 and
    # divides by 3 — count_include_pad=True, matching torch defaults).
    neg = jnp.full((1, F_), -jnp.inf, jnp.float32)
    zro = jnp.zeros((1, F_), jnp.float32)
    xm = jnp.concatenate([neg, x, neg], axis=0)                # (T+2, F)
    xa = jnp.concatenate([zro, x, zro], axis=0)
    x_max = jnp.maximum(jnp.maximum(xm[0:T], xm[1:T + 1]), xm[2:T + 2])
    x_avg = (xa[0:T] + xa[1:T + 1] + xa[2:T + 2]) * (1.0 / 3.0)
    x = x_max + x_avg                                          # (T, F) f32

    # fc1 + ReLU (dropout == identity in eval). bf16 operands, f32 accumulate.
    h = jnp.dot(x.astype(jnp.bfloat16), fc1_wT,
                preferred_element_type=jnp.float32) + fc1_b
    h = jnp.maximum(h, 0.0)                                    # (T, F) f32
    h16 = h.astype(jnp.bfloat16)

    # attention branch: softmax over time of tanh(att(h))
    a = jnp.tanh(jnp.dot(h16, att_wT,
                         preferred_element_type=jnp.float32) + att_b)  # (T, C)
    a = a - jnp.max(a, axis=0, keepdims=True)
    e = jnp.exp(a)
    norm_att = e * pl.reciprocal(jnp.sum(e, axis=0, keepdims=True), approx=True)

    # classification branch
    cla = jax.nn.sigmoid(
        jnp.dot(h16, cla_wT, preferred_element_type=jnp.float32) + cla_b)  # (T, C)

    clip = jnp.sum(norm_att * cla, axis=0, keepdims=True)      # (1, C)
    maxf = jnp.max(cla, axis=0, keepdims=True)                 # (1, C)
    frame = cla.T                                              # (C, T)
    return clip, frame, maxf


def frame_model_kernel(feat1_ref, feat2_ref,
                       f1w_ref, f1b_ref, a1w_ref, a1b_ref, c1w_ref, c1b_ref,
                       f2w_ref, f2b_ref, a2w_ref, a2b_ref, c2w_ref, c2b_ref,
                       clip_ref, frame_ref, maxf_ref, *, w1, w2):
    clip1, frame1, maxf1 = _sed_head(
        feat1_ref[...].astype(jnp.float32),
        f1w_ref[...], f1b_ref[...], a1w_ref[...], a1b_ref[...],
        c1w_ref[...], c1b_ref[...])
    clip2, frame2, maxf2 = _sed_head(
        feat2_ref[...].astype(jnp.float32),
        f2w_ref[...], f2b_ref[...], a2w_ref[...], a2b_ref[...],
        c2w_ref[...], c2b_ref[...])

    clip_ref[...] = (w1 * clip1 + w2 * clip2).astype(clip_ref.dtype)
    frame_ref[...] = (w1 * frame1 + w2 * frame2).astype(frame_ref.dtype)
    maxf_ref[...] = (w1 * maxf1 + w2 * maxf2).astype(maxf_ref.dtype)


def frame_model_forward(feat1, feat2, params1, params2, *, w1=0.7, w2=0.3):
    """feat1: (B, F1, Hf1, T), feat2: (B, F2, Hf2, T) backbone feature maps."""
    B, F1, H1, T = feat1.shape
    B2, F2, H2, T2 = feat2.shape
    assert B == B2 and T == T2
    C = params1["att_w"].shape[0]

    def prep(p):
        bf = jnp.bfloat16
        return dict(
            fc1_wT=p["fc1_w"].T.astype(bf),
            fc1_b=p["fc1_b"].reshape(1, -1).astype(jnp.float32),
            att_wT=p["att_w"].T.astype(bf),
            att_b=p["att_b"].reshape(1, -1).astype(jnp.float32),
            cla_wT=p["cla_w"].T.astype(bf),
            cla_b=p["cla_b"].reshape(1, -1).astype(jnp.float32),
        )

    p1, p2 = prep(params1), prep(params2)
    weight_args = (p1["fc1_wT"], p1["fc1_b"], p1["att_wT"], p1["att_b"],
                   p1["cla_wT"], p1["cla_b"],
                   p2["fc1_wT"], p2["fc1_b"], p2["att_wT"], p2["att_b"],
                   p2["cla_wT"], p2["cla_b"])

    def full(a):  # whole-array block, same tile every grid step (resident weights)
        shape = a.shape
        return pl.BlockSpec(shape, lambda b, _s=shape: (0,) * len(_s))

    in_specs = [
        pl.BlockSpec((None, F1, H1, T), lambda b: (b, 0, 0, 0)),  # feat1 per-batch
        pl.BlockSpec((None, F2, H2, T), lambda b: (b, 0, 0, 0)),  # feat2 per-batch
    ] + [full(a) for a in weight_args]

    out_specs = [
        pl.BlockSpec((None, 1, C), lambda b: (b, 0, 0)),   # clipwise
        pl.BlockSpec((None, C, T), lambda b: (b, 0, 0)),   # framewise
        pl.BlockSpec((None, 1, C), lambda b: (b, 0, 0)),   # maxframewise
    ]
    out_shape = (
        jax.ShapeDtypeStruct((B, 1, C), jnp.float32),
        jax.ShapeDtypeStruct((B, C, T), jnp.float32),
        jax.ShapeDtypeStruct((B, 1, C), jnp.float32),
    )

    flops = B * (2 * T * F1 * (F1 + 2 * C) + 2 * T * F2 * (F2 + 2 * C))
    transcendentals = B * 2 * 3 * T * C
    bytes_accessed = (int(feat1.size) * 4 + int(feat2.size) * 4
                      + sum(int(a.size) * a.dtype.itemsize for a in weight_args)
                      + (B * C + B * C * T + B * C) * 4)
    cost = pl.CostEstimate(flops=flops, transcendentals=transcendentals,
                           bytes_accessed=bytes_accessed)

    kernel = functools.partial(frame_model_kernel, w1=float(w1), w2=float(w2))

    clip, frame, maxf = pl.pallas_call(
        kernel,
        out_shape=out_shape,
        grid_spec=pltpu.PrefetchScalarGridSpec(
            num_scalar_prefetch=0,
            grid=(B,),
            in_specs=in_specs,
            out_specs=out_specs),
        compiler_params=pltpu.CompilerParams(
            dimension_semantics=("parallel",)),
        cost_estimate=cost,
    )(feat1, feat2, *weight_args)

    return {
        "clipwise_output": clip.reshape(B, C),
        "framewise_output": frame,
        "maxframewise_output": maxf.reshape(B, C),
    }


def frame_model_reference(feat1, feat2, params1, params2, *, w1=0.7, w2=0.3):
    """Pure-JAX f32 reference mirroring the PyTorch eval-mode forward."""
    def head(feat, p):
        x = jnp.mean(feat, axis=2)                        # (B, F, T)
        T = x.shape[-1]
        neg = jnp.full(x.shape[:-1] + (1,), -jnp.inf, x.dtype)
        zro = jnp.zeros(x.shape[:-1] + (1,), x.dtype)
        xm = jnp.concatenate([neg, x, neg], axis=-1)
        xa = jnp.concatenate([zro, x, zro], axis=-1)
        x1 = jnp.maximum(jnp.maximum(xm[..., 0:T], xm[..., 1:T + 1]),
                         xm[..., 2:T + 2])
        x2 = (xa[..., 0:T] + xa[..., 1:T + 1] + xa[..., 2:T + 2]) / 3.0
        x = x1 + x2
        xt = jnp.swapaxes(x, 1, 2)                        # (B, T, F)
        h = jax.nn.relu(xt @ p["fc1_w"].T + p["fc1_b"])
        a = jnp.tanh(h @ p["att_w"].T + p["att_b"])       # (B, T, C)
        norm_att = jax.nn.softmax(a, axis=1)
        cla = jax.nn.sigmoid(h @ p["cla_w"].T + p["cla_b"])
        return {
            "clipwise_output": jnp.sum(norm_att * cla, axis=1),
            "framewise_output": jnp.swapaxes(cla, 1, 2),
            "maxframewise_output": jnp.max(cla, axis=1),
        }

    d1 = head(feat1, params1)
    d2 = head(feat2, params2)
    return {k: w1 * d1[k] + w2 * d2[k] for k in d1}


if __name__ == "__main__":
    # Toy shapes: batch 2, 8 time frames, 16 classes; two "backbones" with
    # different channel / frequency extents (32x4 and 48x3).
    B, T, C = 2, 8, 16
    F1, H1 = 32, 4
    F2, H2 = 48, 3

    key = jax.random.PRNGKey(0)
    ks = jax.random.split(key, 16)

    def init(k, shape, scale=0.1):
        return jax.random.normal(k, shape, jnp.float32) * scale

    params1 = {
        "fc1_w": init(ks[0], (F1, F1)),
        "fc1_b": init(ks[1], (F1,)),
        "att_w": init(ks[2], (C, F1)),   # Conv1d(k=1) weight squeezed to 2-D
        "att_b": init(ks[3], (C,)),
        "cla_w": init(ks[4], (C, F1)),
        "cla_b": init(ks[5], (C,)),
    }
    params2 = {
        "fc1_w": init(ks[6], (F2, F2)),
        "fc1_b": init(ks[7], (F2,)),
        "att_w": init(ks[8], (C, F2)),
        "att_b": init(ks[9], (C,)),
        "cla_w": init(ks[10], (C, F2)),
        "cla_b": init(ks[11], (C,)),
    }

    feat1 = jax.random.normal(ks[12], (B, F1, H1, T), jnp.float32)
    feat2 = jax.random.normal(ks[13], (B, F2, H2, T), jnp.float32)

    out = frame_model_forward(feat1, feat2, params1, params2)
    out = jax.block_until_ready(out)

    ref = frame_model_reference(feat1, feat2, params1, params2)

    assert out["clipwise_output"].shape == (B, C)
    assert out["framewise_output"].shape == (B, C, T)
    assert out["maxframewise_output"].shape == (B, C)
    # bf16 matmul operands (f32 accumulation) -> tolerance loosened vs pure-f32.
    for k in ref:
        err = float(jnp.max(jnp.abs(out[k] - ref[k])))
        assert jnp.allclose(out[k], ref[k], rtol=2e-2, atol=2e-2), (k, err)

    print("KERNEL_OK")
</pallas_src>

<mosaic_0001>
module attributes {stable_mosaic.version = 11 : i64} {
  func.func @frame_model_kernel(%arg0: i32, %arg1: memref<1x32x4x8xf32, #tpu.memory_space<vmem>>, %arg2: memref<1x48x3x8xf32, #tpu.memory_space<vmem>>, %arg3: memref<32x32xbf16, #tpu.memory_space<vmem>>, %arg4: memref<1x32xf32, #tpu.memory_space<vmem>>, %arg5: memref<32x16xbf16, #tpu.memory_space<vmem>>, %arg6: memref<1x16xf32, #tpu.memory_space<vmem>>, %arg7: memref<32x16xbf16, #tpu.memory_space<vmem>>, %arg8: memref<1x16xf32, #tpu.memory_space<vmem>>, %arg9: memref<48x48xbf16, #tpu.memory_space<vmem>>, %arg10: memref<1x48xf32, #tpu.memory_space<vmem>>, %arg11: memref<48x16xbf16, #tpu.memory_space<vmem>>, %arg12: memref<1x16xf32, #tpu.memory_space<vmem>>, %arg13: memref<48x16xbf16, #tpu.memory_space<vmem>>, %arg14: memref<1x16xf32, #tpu.memory_space<vmem>>, %arg15: memref<1x1x16xf32, #tpu.memory_space<vmem>>, %arg16: memref<1x16x8xf32, #tpu.memory_space<vmem>>, %arg17: memref<1x1x16xf32, #tpu.memory_space<vmem>>) attributes {dimension_semantics = [#tpu.dimension_semantics<parallel>], iteration_bounds = array<i64: 2>, scalar_prefetch = 0 : i64, scratch_operands = 0 : i64, tpu.core_type = #tpu.core_type<tc>, window_params = [{transform_indices = @transform_0, window_bounds = array<i64: 1, 32, 4, 8>}, {transform_indices = @transform_1, window_bounds = array<i64: 1, 48, 3, 8>}, {pipeline_mode = #tpu.pipeline_mode<synchronous>, transform_indices = @transform_2, window_bounds = array<i64: 32, 32>}, {pipeline_mode = #tpu.pipeline_mode<synchronous>, transform_indices = @transform_3, window_bounds = array<i64: 1, 32>}, {pipeline_mode = #tpu.pipeline_mode<synchronous>, transform_indices = @transform_4, window_bounds = array<i64: 32, 16>}, {pipeline_mode = #tpu.pipeline_mode<synchronous>, transform_indices = @transform_5, window_bounds = array<i64: 1, 16>}, {pipeline_mode = #tpu.pipeline_mode<synchronous>, transform_indices = @transform_6, window_bounds = array<i64: 32, 16>}, {pipeline_mode = #tpu.pipeline_mode<synchronous>, transform_indices = @transform_7, window_bounds = array<i64: 1, 16>}, {pipeline_mode = #tpu.pipeline_mode<synchronous>, transform_indices = @transform_8, window_bounds = array<i64: 48, 48>}, {pipeline_mode = #tpu.pipeline_mode<synchronous>, transform_indices = @transform_9, window_bounds = array<i64: 1, 48>}, {pipeline_mode = #tpu.pipeline_mode<synchronous>, transform_indices = @transform_10, window_bounds = array<i64: 48, 16>}, {pipeline_mode = #tpu.pipeline_mode<synchronous>, transform_indices = @transform_11, window_bounds = array<i64: 1, 16>}, {pipeline_mode = #tpu.pipeline_mode<synchronous>, transform_indices = @transform_12, window_bounds = array<i64: 48, 16>}, {pipeline_mode = #tpu.pipeline_mode<synchronous>, transform_indices = @transform_13, window_bounds = array<i64: 1, 16>}, {transform_indices = @transform_14, window_bounds = array<i64: 1, 1, 16>}, {transform_indices = @transform_15, window_bounds = array<i64: 1, 16, 8>}, {transform_indices = @transform_16, window_bounds = array<i64: 1, 1, 16>}]} {
    %c0 = arith.constant 0 : index
    %c0_0 = arith.constant 0 : index
    %c0_1 = arith.constant 0 : index
    %c0_2 = arith.constant 0 : index
    %0 = vector.load %arg1[%c0, %c0_0, %c0_1, %c0_2] : memref<1x32x4x8xf32, #tpu.memory_space<vmem>>, vector<1x32x4x8xf32>
    %1 = vector.shape_cast %0 : vector<1x32x4x8xf32> to vector<32x4x8xf32>
    %c0_3 = arith.constant 0 : index
    %c0_4 = arith.constant 0 : index
    %2 = vector.load %arg3[%c0_3, %c0_4] : memref<32x32xbf16, #tpu.memory_space<vmem>>, vector<32x32xbf16>
    %c0_5 = arith.constant 0 : index
    %c0_6 = arith.constant 0 : index
    %3 = vector.load %arg4[%c0_5, %c0_6] : memref<1x32xf32, #tpu.memory_space<vmem>>, vector<1x32xf32>
    %c0_7 = arith.constant 0 : index
    %c0_8 = arith.constant 0 : index
    %4 = vector.load %arg5[%c0_7, %c0_8] : memref<32x16xbf16, #tpu.memory_space<vmem>>, vector<32x16xbf16>
    %c0_9 = arith.constant 0 : index
    %c0_10 = arith.constant 0 : index
    %5 = vector.load %arg6[%c0_9, %c0_10] : memref<1x16xf32, #tpu.memory_space<vmem>>, vector<1x16xf32>
    %c0_11 = arith.constant 0 : index
    %c0_12 = arith.constant 0 : index
    %6 = vector.load %arg7[%c0_11, %c0_12] : memref<32x16xbf16, #tpu.memory_space<vmem>>, vector<32x16xbf16>
    %c0_13 = arith.constant 0 : index
    %c0_14 = arith.constant 0 : index
    %7 = vector.load %arg8[%c0_13, %c0_14] : memref<1x16xf32, #tpu.memory_space<vmem>>, vector<1x16xf32>
    %cst = arith.constant dense<0.000000e+00> : vector<32x8xf32>
    %8 = vector.multi_reduction <add>, %1, %cst [1] : vector<32x4x8xf32> to vector<32x8xf32>
    %cst_15 = arith.constant 4.000000e+00 : f32
    %9 = vector.broadcast %cst_15 : f32 to vector<32x8xf32>
    %10 = arith.divf %8, %9 : vector<32x8xf32>
    %11 = tpu.transpose %10, [1, 0] : vector<32x8xf32> -> vector<8x32xf32>
    %cst_16 = arith.constant 0xFF800000 : f32
    %12 = vector.broadcast %cst_16 : f32 to vector<1x32xf32>
    %cst_17 = arith.constant 0.000000e+00 : f32
    %13 = vector.broadcast %cst_17 : f32 to vector<1x32xf32>
    %14 = tpu.concatenate %12, %11, %12 in 0 : vector<1x32xf32>, vector<8x32xf32>, vector<1x32xf32> -> vector<10x32xf32>
    %15 = tpu.concatenate %13, %11, %13 in 0 : vector<1x32xf32>, vector<8x32xf32>, vector<1x32xf32> -> vector<10x32xf32>
    %16 = vector.extract_strided_slice %14 {offsets = [0, 0], sizes = [8, 32], strides = [1, 1]} : vector<10x32xf32> to vector<8x32xf32>
    %17 = vector.extract_strided_slice %14 {offsets = [1, 0], sizes = [8, 32], strides = [1, 1]} : vector<10x32xf32> to vector<8x32xf32>
    %18 = arith.maximumf %16, %17 : vector<8x32xf32>
    %19 = vector.extract_strided_slice %14 {offsets = [2, 0], sizes = [8, 32], strides = [1, 1]} : vector<10x32xf32> to vector<8x32xf32>
    %20 = arith.maximumf %18, %19 : vector<8x32xf32>
    %21 = vector.extract_strided_slice %15 {offsets = [0, 0], sizes = [8, 32], strides = [1, 1]} : vector<10x32xf32> to vector<8x32xf32>
    %22 = vector.extract_strided_slice %15 {offsets = [1, 0], sizes = [8, 32], strides = [1, 1]} : vector<10x32xf32> to vector<8x32xf32>
    %23 = arith.addf %21, %22 : vector<8x32xf32>
    %24 = vector.extract_strided_slice %15 {offsets = [2, 0], sizes = [8, 32], strides = [1, 1]} : vector<10x32xf32> to vector<8x32xf32>
    %25 = arith.addf %23, %24 : vector<8x32xf32>
    %cst_18 = arith.constant 0.333333343 : f32
    %26 = vector.broadcast %cst_18 : f32 to vector<8x32xf32>
    %27 = arith.mulf %25, %26 : vector<8x32xf32>
    %28 = arith.addf %20, %27 : vector<8x32xf32>
    %29 = arith.truncf %28 : vector<8x32xf32> to vector<8x32xbf16>
    %cst_19 = arith.constant dense<0.000000e+00> : vector<8x32xf32>
    %30 = tpu.matmul %29, %2, %cst_19 {dimension_numbers = #tpu.dot_dimension_numbers<[1], [0], [0], [1], [0, 0, 1, 1], [], []>} : vector<8x32xbf16>, vector<32x32xbf16>, vector<8x32xf32> -> vector<8x32xf32>
    %31 = vector.broadcast %3 : vector<1x32xf32> to vector<8x32xf32>
    %32 = arith.addf %30, %31 : vector<8x32xf32>
    %cst_20 = arith.constant 0.000000e+00 : f32
    %33 = vector.broadcast %cst_20 : f32 to vector<8x32xf32>
    %34 = arith.maximumf %32, %33 : vector<8x32xf32>
    %35 = arith.truncf %34 : vector<8x32xf32> to vector<8x32xbf16>
    %cst_21 = arith.constant dense<0.000000e+00> : vector<8x16xf32>
    %36 = tpu.matmul %35, %4, %cst_21 {dimension_numbers = #tpu.dot_dimension_numbers<[1], [0], [0], [1], [0, 0, 1, 1], [], []>} : vector<8x32xbf16>, vector<32x16xbf16>, vector<8x16xf32> -> vector<8x16xf32>
    %37 = vector.broadcast %5 : vector<1x16xf32> to vector<8x16xf32>
    %38 = arith.addf %36, %37 : vector<8x16xf32>
    %39 = math.tanh %38 : vector<8x16xf32>
    %cst_22 = arith.constant dense<0xFF800000> : vector<16xf32>
    %40 = vector.multi_reduction <maximumf>, %39, %cst_22 [0] : vector<8x16xf32> to vector<16xf32>
    %41 = vector.shape_cast %40 : vector<16xf32> to vector<1x16xf32>
    %42 = vector.broadcast %41 : vector<1x16xf32> to vector<8x16xf32>
    %43 = arith.subf %39, %42 : vector<8x16xf32>
    %44 = math.exp %43 : vector<8x16xf32>
    %cst_23 = arith.constant dense<0.000000e+00> : vector<16xf32>
    %45 = vector.multi_reduction <add>, %44, %cst_23 [0] : vector<8x16xf32> to vector<16xf32>
    %46 = vector.shape_cast %45 : vector<16xf32> to vector<1x16xf32>
    %47 = tpu.reciprocal %46 {approx = true} : vector<1x16xf32> -> vector<1x16xf32>
    %48 = vector.broadcast %47 : vector<1x16xf32> to vector<8x16xf32>
    %49 = arith.mulf %44, %48 : vector<8x16xf32>
    %cst_24 = arith.constant dense<0.000000e+00> : vector<8x16xf32>
    %50 = tpu.matmul %35, %6, %cst_24 {dimension_numbers = #tpu.dot_dimension_numbers<[1], [0], [0], [1], [0, 0, 1, 1], [], []>} : vector<8x32xbf16>, vector<32x16xbf16>, vector<8x16xf32> -> vector<8x16xf32>
    %51 = vector.broadcast %7 : vector<1x16xf32> to vector<8x16xf32>
    %52 = arith.addf %50, %51 : vector<8x16xf32>
    %53 = arith.negf %52 : vector<8x16xf32>
    %54 = math.exp %53 : vector<8x16xf32>
    %cst_25 = arith.constant 1.000000e+00 : f32
    %55 = vector.broadcast %cst_25 : f32 to vector<8x16xf32>
    %56 = arith.addf %55, %54 : vector<8x16xf32>
    %57 = arith.divf %55, %56 : vector<8x16xf32>
    %58 = arith.mulf %49, %57 : vector<8x16xf32>
    %cst_26 = arith.constant dense<0.000000e+00> : vector<16xf32>
    %59 = vector.multi_reduction <add>, %58, %cst_26 [0] : vector<8x16xf32> to vector<16xf32>
    %60 = vector.shape_cast %59 : vector<16xf32> to vector<1x16xf32>
    %cst_27 = arith.constant dense<0xFF800000> : vector<16xf32>
    %61 = vector.multi_reduction <maximumf>, %57, %cst_27 [0] : vector<8x16xf32> to vector<16xf32>
    %62 = vector.shape_cast %61 : vector<16xf32> to vector<1x16xf32>
    %63 = tpu.transpose %57, [1, 0] : vector<8x16xf32> -> vector<16x8xf32>
    %c0_28 = arith.constant 0 : index
    %c0_29 = arith.constant 0 : index
    %c0_30 = arith.constant 0 : index
    %c0_31 = arith.constant 0 : index
    %64 = vector.load %arg2[%c0_28, %c0_29, %c0_30, %c0_31] : memref<1x48x3x8xf32, #tpu.memory_space<vmem>>, vector<1x48x3x8xf32>
    %65 = vector.shape_cast %64 : vector<1x48x3x8xf32> to vector<48x3x8xf32>
    %c0_32 = arith.constant 0 : index
    %c0_33 = arith.constant 0 : index
    %66 = vector.load %arg9[%c0_32, %c0_33] : memref<48x48xbf16, #tpu.memory_space<vmem>>, vector<48x48xbf16>
    %c0_34 = arith.constant 0 : index
    %c0_35 = arith.constant 0 : index
    %67 = vector.load %arg10[%c0_34, %c0_35] : memref<1x48xf32, #tpu.memory_space<vmem>>, vector<1x48xf32>
    %c0_36 = arith.constant 0 : index
    %c0_37 = arith.constant 0 : index
    %68 = vector.load %arg11[%c0_36, %c0_37] : memref<48x16xbf16, #tpu.memory_space<vmem>>, vector<48x16xbf16>
    %c0_38 = arith.constant 0 : index
    %c0_39 = arith.constant 0 : index
    %69 = vector.load %arg12[%c0_38, %c0_39] : memref<1x16xf32, #tpu.memory_space<vmem>>, vector<1x16xf32>
    %c0_40 = arith.constant 0 : index
    %c0_41 = arith.constant 0 : index
    %70 = vector.load %arg13[%c0_40, %c0_41] : memref<48x16xbf16, #tpu.memory_space<vmem>>, vector<48x16xbf16>
    %c0_42 = arith.constant 0 : index
    %c0_43 = arith.constant 0 : index
    %71 = vector.load %arg14[%c0_42, %c0_43] : memref<1x16xf32, #tpu.memory_space<vmem>>, vector<1x16xf32>
    %cst_44 = arith.constant dense<0.000000e+00> : vector<48x8xf32>
    %72 = vector.multi_reduction <add>, %65, %cst_44 [1] : vector<48x3x8xf32> to vector<48x8xf32>
    %cst_45 = arith.constant 3.000000e+00 : f32
    %73 = vector.broadcast %cst_45 : f32 to vector<48x8xf32>
    %74 = arith.divf %72, %73 : vector<48x8xf32>
    %75 = tpu.transpose %74, [1, 0] : vector<48x8xf32> -> vector<8x48xf32>
    %cst_46 = arith.constant 0xFF800000 : f32
    %76 = vector.broadcast %cst_46 : f32 to vector<1x48xf32>
    %cst_47 = arith.constant 0.000000e+00 : f32
    %77 = vector.broadcast %cst_47 : f32 to vector<1x48xf32>
    %78 = tpu.concatenate %76, %75, %76 in 0 : vector<1x48xf32>, vector<8x48xf32>, vector<1x48xf32> -> vector<10x48xf32>
    %79 = tpu.concatenate %77, %75, %77 in 0 : vector<1x48xf32>, vector<8x48xf32>, vector<1x48xf32> -> vector<10x48xf32>
    %80 = vector.extract_strided_slice %78 {offsets = [0, 0], sizes = [8, 48], strides = [1, 1]} : vector<10x48xf32> to vector<8x48xf32>
    %81 = vector.extract_strided_slice %78 {offsets = [1, 0], sizes = [8, 48], strides = [1, 1]} : vector<10x48xf32> to vector<8x48xf32>
    %82 = arith.maximumf %80, %81 : vector<8x48xf32>
    %83 = vector.extract_strided_slice %78 {offsets = [2, 0], sizes = [8, 48], strides = [1, 1]} : vector<10x48xf32> to vector<8x48xf32>
    %84 = arith.maximumf %82, %83 : vector<8x48xf32>
    %85 = vector.extract_strided_slice %79 {offsets = [0, 0], sizes = [8, 48], strides = [1, 1]} : vector<10x48xf32> to vector<8x48xf32>
    %86 = vector.extract_strided_slice %79 {offsets = [1, 0], sizes = [8, 48], strides = [1, 1]} : vector<10x48xf32> to vector<8x48xf32>
    %87 = arith.addf %85, %86 : vector<8x48xf32>
    %88 = vector.extract_strided_slice %79 {offsets = [2, 0], sizes = [8, 48], strides = [1, 1]} : vector<10x48xf32> to vector<8x48xf32>
    %89 = arith.addf %87, %88 : vector<8x48xf32>
    %cst_48 = arith.constant 0.333333343 : f32
    %90 = vector.broadcast %cst_48 : f32 to vector<8x48xf32>
    %91 = arith.mulf %89, %90 : vector<8x48xf32>
    %92 = arith.addf %84, %91 : vector<8x48xf32>
    %93 = arith.truncf %92 : vector<8x48xf32> to vector<8x48xbf16>
    %cst_49 = arith.constant dense<0.000000e+00> : vector<8x48xf32>
    %94 = tpu.matmul %93, %66, %cst_49 {dimension_numbers = #tpu.dot_dimension_numbers<[1], [0], [0], [1], [0, 0, 1, 1], [], []>} : vector<8x48xbf16>, vector<48x48xbf16>, vector<8x48xf32> -> vector<8x48xf32>
    %95 = vector.broadcast %67 : vector<1x48xf32> to vector<8x48xf32>
    %96 = arith.addf %94, %95 : vector<8x48xf32>
    %cst_50 = arith.constant 0.000000e+00 : f32
    %97 = vector.broadcast %cst_50 : f32 to vector<8x48xf32>
    %98 = arith.maximumf %96, %97 : vector<8x48xf32>
    %99 = arith.truncf %98 : vector<8x48xf32> to vector<8x48xbf16>
    %cst_51 = arith.constant dense<0.000000e+00> : vector<8x16xf32>
    %100 = tpu.matmul %99, %68, %cst_51 {dimension_numbers = #tpu.dot_dimension_numbers<[1], [0], [0], [1], [0, 0, 1, 1], [], []>} : vector<8x48xbf16>, vector<48x16xbf16>, vector<8x16xf32> -> vector<8x16xf32>
    %101 = vector.broadcast %69 : vector<1x16xf32> to vector<8x16xf32>
    %102 = arith.addf %100, %101 : vector<8x16xf32>
    %103 = math.tanh %102 : vector<8x16xf32>
    %cst_52 = arith.constant dense<0xFF800000> : vector<16xf32>
    %104 = vector.multi_reduction <maximumf>, %103, %cst_52 [0] : vector<8x16xf32> to vector<16xf32>
    %105 = vector.shape_cast %104 : vector<16xf32> to vector<1x16xf32>
    %106 = vector.broadcast %105 : vector<1x16xf32> to vector<8x16xf32>
    %107 = arith.subf %103, %106 : vector<8x16xf32>
    %108 = math.exp %107 : vector<8x16xf32>
    %cst_53 = arith.constant dense<0.000000e+00> : vector<16xf32>
    %109 = vector.multi_reduction <add>, %108, %cst_53 [0] : vector<8x16xf32> to vector<16xf32>
    %110 = vector.shape_cast %109 : vector<16xf32> to vector<1x16xf32>
    %111 = tpu.reciprocal %110 {approx = true} : vector<1x16xf32> -> vector<1x16xf32>
    %112 = vector.broadcast %111 : vector<1x16xf32> to vector<8x16xf32>
    %113 = arith.mulf %108, %112 : vector<8x16xf32>
    %cst_54 = arith.constant dense<0.000000e+00> : vector<8x16xf32>
    %114 = tpu.matmul %99, %70, %cst_54 {dimension_numbers = #tpu.dot_dimension_numbers<[1], [0], [0], [1], [0, 0, 1, 1], [], []>} : vector<8x48xbf16>, vector<48x16xbf16>, vector<8x16xf32> -> vector<8x16xf32>
    %115 = vector.broadcast %71 : vector<1x16xf32> to vector<8x16xf32>
    %116 = arith.addf %114, %115 : vector<8x16xf32>
    %117 = arith.negf %116 : vector<8x16xf32>
    %118 = math.exp %117 : vector<8x16xf32>
    %cst_55 = arith.constant 1.000000e+00 : f32
    %119 = vector.broadcast %cst_55 : f32 to vector<8x16xf32>
    %120 = arith.addf %119, %118 : vector<8x16xf32>
    %121 = arith.divf %119, %120 : vector<8x16xf32>
    %122 = arith.mulf %113, %121 : vector<8x16xf32>
    %cst_56 = arith.constant dense<0.000000e+00> : vector<16xf32>
    %123 = vector.multi_reduction <add>, %122, %cst_56 [0] : vector<8x16xf32> to vector<16xf32>
    %124 = vector.shape_cast %123 : vector<16xf32> to vector<1x16xf32>
    %cst_57 = arith.constant dense<0xFF800000> : vector<16xf32>
    %125 = vector.multi_reduction <maximumf>, %121, %cst_57 [0] : vector<8x16xf32> to vector<16xf32>
    %126 = vector.shape_cast %125 : vector<16xf32> to vector<1x16xf32>
    %127 = tpu.transpose %121, [1, 0] : vector<8x16xf32> -> vector<16x8xf32>
    %cst_58 = arith.constant 0.699999988 : f32
    %128 = vector.broadcast %cst_58 : f32 to vector<1x16xf32>
    %129 = arith.mulf %128, %60 : vector<1x16xf32>
    %cst_59 = arith.constant 3.000000e-01 : f32
    %130 = vector.broadcast %cst_59 : f32 to vector<1x16xf32>
    %131 = arith.mulf %130, %124 : vector<1x16xf32>
    %132 = arith.addf %129, %131 : vector<1x16xf32>
    %c0_60 = arith.constant 0 : index
    %c0_61 = arith.constant 0 : index
    %c0_62 = arith.constant 0 : index
    %133 = vector.load %arg15[%c0_60, %c0_61, %c0_62] : memref<1x1x16xf32, #tpu.memory_space<vmem>>, vector<1x1x16xf32>
    %134 = vector.shape_cast %133 : vector<1x1x16xf32> to vector<1x16xf32>
    %135 = vector.shape_cast %132 : vector<1x16xf32> to vector<1x1x16xf32>
    tpu.vector_store %arg15[%c0_60, %c0_61, %c0_62], %135 {strides = array<i32>} : memref<1x1x16xf32, #tpu.memory_space<vmem>>, vector<1x1x16xf32>,
    %cst_63 = arith.constant 0.699999988 : f32
    %136 = vector.broadcast %cst_63 : f32 to vector<16x8xf32>
    %137 = arith.mulf %136, %63 : vector<16x8xf32>
    %cst_64 = arith.constant 3.000000e-01 : f32
    %138 = vector.broadcast %cst_64 : f32 to vector<16x8xf32>
    %139 = arith.mulf %138, %127 : vector<16x8xf32>
    %140 = arith.addf %137, %139 : vector<16x8xf32>
    %c0_65 = arith.constant 0 : index
    %c0_66 = arith.constant 0 : index
    %c0_67 = arith.constant 0 : index
    %141 = vector.load %arg16[%c0_65, %c0_66, %c0_67] : memref<1x16x8xf32, #tpu.memory_space<vmem>>, vector<1x16x8xf32>
    %142 = vector.shape_cast %141 : vector<1x16x8xf32> to vector<16x8xf32>
    %143 = vector.shape_cast %140 : vector<16x8xf32> to vector<1x16x8xf32>
    tpu.vector_store %arg16[%c0_65, %c0_66, %c0_67], %143 {strides = array<i32>} : memref<1x16x8xf32, #tpu.memory_space<vmem>>, vector<1x16x8xf32>,
    %cst_68 = arith.constant 0.699999988 : f32
    %144 = vector.broadcast %cst_68 : f32 to vector<1x16xf32>
    %145 = arith.mulf %144, %62 : vector<1x16xf32>
    %cst_69 = arith.constant 3.000000e-01 : f32
    %146 = vector.broadcast %cst_69 : f32 to vector<1x16xf32>
    %147 = arith.mulf %146, %126 : vector<1x16xf32>
    %148 = arith.addf %145, %147 : vector<1x16xf32>
    %c0_70 = arith.constant 0 : index
    %c0_71 = arith.constant 0 : index
    %c0_72 = arith.constant 0 : index
    %149 = vector.load %arg17[%c0_70, %c0_71, %c0_72] : memref<1x1x16xf32, #tpu.memory_space<vmem>>, vector<1x1x16xf32>
    %150 = vector.shape_cast %149 : vector<1x1x16xf32> to vector<1x16xf32>
    %151 = vector.shape_cast %148 : vector<1x16xf32> to vector<1x1x16xf32>
    tpu.vector_store %arg17[%c0_70, %c0_71, %c0_72], %151 {strides = array<i32>} : memref<1x1x16xf32, #tpu.memory_space<vmem>>, vector<1x1x16xf32>,
    return
  }
  func.func @transform_0(%arg0: i32) -> (i32, i32, i32, i32) {
    %c0_i32 = arith.constant 0 : i32
    %c0_i32_0 = arith.constant 0 : i32
    %c0_i32_1 = arith.constant 0 : i32
    %c0_i32_2 = arith.constant 0 : i32
    return %arg0, %c0_i32, %c0_i32_0, %c0_i32_1 : i32, i32, i32, i32
  }
  func.func @transform_1(%arg0: i32) -> (i32, i32, i32, i32) {
    %c0_i32 = arith.constant 0 : i32
    %c0_i32_0 = arith.constant 0 : i32
    %c0_i32_1 = arith.constant 0 : i32
    %c0_i32_2 = arith.constant 0 : i32
    return %arg0, %c0_i32, %c0_i32_0, %c0_i32_1 : i32, i32, i32, i32
  }
  func.func @transform_2(%arg0: i32) -> (i32, i32) {
    %c0_i32 = arith.constant 0 : i32
    %c0_i32_0 = arith.constant 0 : i32
    %c0_i32_1 = arith.constant 0 : i32
    return %c0_i32, %c0_i32_0 : i32, i32
  }
  func.func @transform_3(%arg0: i32) -> (i32, i32) {
    %c0_i32 = arith.constant 0 : i32
    %c0_i32_0 = arith.constant 0 : i32
    %c0_i32_1 = arith.constant 0 : i32
    return %c0_i32, %c0_i32_0 : i32, i32
  }
  func.func @transform_4(%arg0: i32) -> (i32, i32) {
    %c0_i32 = arith.constant 0 : i32
    %c0_i32_0 = arith.constant 0 : i32
    %c0_i32_1 = arith.constant 0 : i32
    return %c0_i32, %c0_i32_0 : i32, i32
  }
  func.func @transform_5(%arg0: i32) -> (i32, i32) {
    %c0_i32 = arith.constant 0 : i32
    %c0_i32_0 = arith.constant 0 : i32
    %c0_i32_1 = arith.constant 0 : i32
    return %c0_i32, %c0_i32_0 : i32, i32
  }
  func.func @transform_6(%arg0: i32) -> (i32, i32) {
    %c0_i32 = arith.constant 0 : i32
    %c0_i32_0 = arith.constant 0 : i32
    %c0_i32_1 = arith.constant 0 : i32
    return %c0_i32, %c0_i32_0 : i32, i32
  }
  func.func @transform_7(%arg0: i32) -> (i32, i32) {
    %c0_i32 = arith.constant 0 : i32
    %c0_i32_0 = arith.constant 0 : i32
    %c0_i32_1 = arith.constant 0 : i32
    return %c0_i32, %c0_i32_0 : i32, i32
  }
  func.func @transform_8(%arg0: i32) -> (i32, i32) {
    %c0_i32 = arith.constant 0 : i32
    %c0_i32_0 = arith.constant 0 : i32
    %c0_i32_1 = arith.constant 0 : i32
    return %c0_i32, %c0_i32_0 : i32, i32
  }
  func.func @transform_9(%arg0: i32) -> (i32, i32) {
    %c0_i32 = arith.constant 0 : i32
    %c0_i32_0 = arith.constant 0 : i32
    %c0_i32_1 = arith.constant 0 : i32
    return %c0_i32, %c0_i32_0 : i32, i32
  }
  func.func @transform_10(%arg0: i32) -> (i32, i32) {
    %c0_i32 = arith.constant 0 : i32
    %c0_i32_0 = arith.constant 0 : i32
    %c0_i32_1 = arith.constant 0 : i32
    return %c0_i32, %c0_i32_0 : i32, i32
  }
  func.func @transform_11(%arg0: i32) -> (i32, i32) {
    %c0_i32 = arith.constant 0 : i32
    %c0_i32_0 = arith.constant 0 : i32
    %c0_i32_1 = arith.constant 0 : i32
    return %c0_i32, %c0_i32_0 : i32, i32
  }
  func.func @transform_12(%arg0: i32) -> (i32, i32) {
    %c0_i32 = arith.constant 0 : i32
    %c0_i32_0 = arith.constant 0 : i32
    %c0_i32_1 = arith.constant 0 : i32
    return %c0_i32, %c0_i32_0 : i32, i32
  }
  func.func @transform_13(%arg0: i32) -> (i32, i32) {
    %c0_i32 = arith.constant 0 : i32
    %c0_i32_0 = arith.constant 0 : i32
    %c0_i32_1 = arith.constant 0 : i32
    return %c0_i32, %c0_i32_0 : i32, i32
  }
  func.func @transform_14(%arg0: i32) -> (i32, i32, i32) {
    %c0_i32 = arith.constant 0 : i32
    %c0_i32_0 = arith.constant 0 : i32
    %c0_i32_1 = arith.constant 0 : i32
    return %arg0, %c0_i32, %c0_i32_0 : i32, i32, i32
  }
  func.func @transform_15(%arg0: i32) -> (i32, i32, i32) {
    %c0_i32 = arith.constant 0 : i32
    %c0_i32_0 = arith.constant 0 : i32
    %c0_i32_1 = arith.constant 0 : i32
    return %arg0, %c0_i32, %c0_i32_0 : i32, i32, i32
  }
  func.func @transform_16(%arg0: i32) -> (i32, i32, i32) {
    %c0_i32 = arith.constant 0 : i32
    %c0_i32_0 = arith.constant 0 : i32
    %c0_i32_1 = arith.constant 0 : i32
    return %arg0, %c0_i32, %c0_i32_0 : i32, i32, i32
  }
}

</mosaic_0001>

<bundles_post_ra>
// kernel: tpu_custom_call.1
= control target key start
LH: loop header
LB: loop body
LE: loop exit
PB: predicated region body
PF: predicated region fallthrough
CT: control target
= control target key end

     0   :  { %s3212_s0 = inlined_call_operand.vmem [shape: f32[2,32,4,8], index: 0, kind: input, shape index: {}]   ;;  %s3213_s1 = inlined_call_operand.vmem [shape: f32[2,48,3,8], index: 1, kind: input, shape index: {}]   ;;  %s3214_s2 = inlined_call_operand.vmem [shape: bf16[32,32], index: 2, kind: input, shape index: {}]   ;;  %s3215_s3 = inlined_call_operand.vmem [shape: f32[1,32], index: 3, kind: input, shape index: {}]   ;;  %s3216_s4 = inlined_call_operand.vmem [shape: bf16[32,16], index: 4, kind: input, shape index: {}]   ;;  %s3217_s5 = inlined_call_operand.vmem [shape: f32[1,16], index: 5, kind: input, shape index: {}]   ;;  %s3218_s6 = inlined_call_operand.vmem [shape: bf16[32,16], index: 6, kind: input, shape index: {}]   ;;  %s3219_s7 = inlined_call_operand.vmem [shape: f32[1,16], index: 7, kind: input, shape index: {}]   ;;  %s3220_s8 = inlined_call_operand.vmem [shape: bf16[48,48], index: 8, kind: input, shape index: {}]   ;;  %s3221_s9 = inlined_call_operand.vmem [shape: f32[1,48], index: 9, kind: input, shape index: {}]   ;;  %s3222_s10 = inlined_call_operand.vmem [shape: bf16[48,16], index: 10, kind: input, shape index: {}]   ;;  %s3223_s11 = inlined_call_operand.vmem [shape: f32[1,16], index: 11, kind: input, shape index: {}]   ;;  %s3224_s12 = inlined_call_operand.vmem [shape: bf16[48,16], index: 12, kind: input, shape index: {}]   ;;  %s3225_s13 = inlined_call_operand.vmem [shape: f32[1,16], index: 13, kind: input, shape index: {}]   ;;  %s3226_s14 = inlined_call_operand.hbm [shape: f32[2,1,16], index: 14, kind: output, shape index: {0}]   ;;  %s3227_s15 = inlined_call_operand.vmem [shape: f32[2,16,8], index: 15, kind: output, shape index: {1}]   ;;  %s3228_s16 = inlined_call_operand.hbm [shape: f32[2,1,16], index: 16, kind: output, shape index: {2}]  }
   0x1   :  { %3230 = sst [smem:[#allocation8_spill]] %s3212_s0 }
   0x2   :  { %3231 = sst [smem:[#allocation9_spill]] %s3213_s1 }
   0x3   :  { %3232 = sst [smem:[#allocation10_spill]] %s3214_s2 }
   0x4   :  { %3233 = sst [smem:[#allocation11_spill]] %s3215_s3 }
   0x5   :  { %3234 = sst [smem:[#allocation12_spill]] %s3216_s4 }
   0x6   :  { %3235 = sst [smem:[#allocation13_spill]] %s3217_s5 }
   0x7   :  { %3236 = sst [smem:[#allocation14_spill]] %s3218_s6 }
   0x8   :  { %3237 = sst [smem:[#allocation15_spill]] %s3219_s7 }
   0x9   :  { %3238 = sst [smem:[#allocation16_spill]] %s3220_s8 }
   0xa   :  { %22 = vsyncpa [#allocation3], 0 }
   0xb   :  { %24 = vsyncpa [#allocation3 + $0x1], 0 }
   0xc   :  { %25 = vsyncpa [#allocation5], 0 }
   0xd   :  { %27 = vsyncpa [#allocation5 + $0x1], 0  ;;  %s2713_s21 = smov 0   ;;  %s2715_s22 = smov 0  }
   0xe   :  { %s2717_s23 = smov 0   ;;  %s2719_s24 = smov 0  }
   0xf LB: > { %s2734_s25 = sadd.s32 4294967295, %s2622_s24   ;;  %s2331_s26 = sadd.s32 4294967294, %s2622_s24   ;;  %s2622_s24 = sphi %s2719_s24, %s3254_s24   ;;  %s2618_s23 = sphi %s2717_s23, %s3253_s23   ;;  %s2614_s22 = sphi %s2715_s22, %s3252_s22   ;;  %s2610_s21 = sphi %s2713_s21, %s3251_s21  }
  0x10   : > { %s2738_s27 = sadd.s32 1, %s2622_s24   ;;  %s344_s28 = sadd.s32 1, %s2618_s23 }
  0x11   : > { %s341_s29 = ssub.s32 %s2622_s24, %s2738_s27  ;;  %p354_p0 = scmp.ne.s32.totalorder %s2618_s23, %s2614_s22 }
  0x12   : > { %p342_p1 = scmp.eq.s32.totalorder %s341_s29, 0  ;;  %p355_p2 = scmp.eq.s32.totalorder %s2734_s25, 1 }
  0x13   : > { %p360_p3 = scmp.ne.s32.totalorder %s2614_s22, %s2610_s21  ;;  %p361_p4 = scmp.eq.s32.totalorder %s2331_s26, 1 }
  0x14   : > { %s2749_s30 = scalar_select %p342_p1, %s2618_s23, %s344_s28  }
  0x15   : > { %p2751_p5 = por %p355_p2, %p354_p0  ;;  %p2755_p6 = por %p361_p4, %p360_p3 }
  0x16   : > { %p2334_p7 = scmp.ge.s32.totalorder %s2622_s24, 1  ;;  %p483_p8 = scmp.lt.s32.totalorder %s2622_s24, 3 }
  0x18   : > { %p484_p9 = pnand %p2334_p7, %p483_p8 }
  0x19   : > { %p546_p10 = scmp.lt.s32.totalorder (!%p484_p9), %s2734_s25, 1  ;;  %s3241_s28 = sld [smem:[#allocation8_spill]] (!%p484_p9) }
  0x1a   : > { %487 = sbr.rel (%p484_p9) target bundleno = 1014 (0x3f6), region = 76  ;;  %s3242_s2 = sld [smem:[#allocation10_spill]] (!%p484_p9) }
  0x1b   : > { %s3243_s1 = sld [smem:[#allocation9_spill]] (!%p484_p9) }
  0x1c   : > { %s3244_s4 = sld [smem:[#allocation12_spill]] (!%p484_p9) }
  0x1d   : > { %s3245_s6 = sld [smem:[#allocation14_spill]] (!%p484_p9) }
  0x1e   : > { %s3246_s3 = sld [smem:[#allocation11_spill]] (!%p484_p9) }
  0x1f   : > { %s2763_s18 = scalar_select %p546_p10, %s2734_s25, 1  ;;  %vm609_vm0 = vcmask 60416   ;;  %vm899_vm1 = vcmask 1041409   ;;  %vm901_vm2 = vcmask 1042434   ;;  %vm903_vm3 = vcmask 1043459  }
  0x20   : > { %vm905_vm4 = vcmask 1044484   ;;  %vm907_vm5 = vcmask 1045509   ;;  %vm909_vm6 = vcmask 1046534   ;;  %vm911_vm7 = vcmask 1047559   ;;  %s3247_s8 = sld [smem:[#allocation16_spill]] }
  0x21   : > { %s2373_s19 = sshll.u32 %s2763_s18, 7  ;;  %vm2625_vm8 = vmmov 0   ;;  %vm1333_vm9 = vcmask 59392   ;;  %vm973_vm10 = vcmask 1040384   ;;  %vm980_vm11 = vcmask 1046528   ;;  %s3248_s5 = sld [smem:[#allocation13_spill]] }
  0x22   : > { %s2769_s29 = scalar_lea.vmem %s3241_s28, %s2373_s19  ;;  %vm986_vm12 = vcmask 1045504   ;;  %vm1025_vm13 = vcmask 261120   ;;  %vm1905_vm14 = vcmask 392192   ;;  %s3249_s7 = sld [smem:[#allocation15_spill]]  ;;  %vm1133_vm15 = vcmask 130048  }
  0x23   : > { %v562_v0 = vld [vmem:[%s2769_s29] sm:$0xf]  ;;  %v563_v1 = vld [vmem:[%s2769_s29 + $0x4] sm:$0xf]  ;;  %v564_v2 = vld [vmem:[%s2769_s29 + $0x8] sm:$0xf] }
  0x24   : > { %v565_v3 = vld [vmem:[%s2769_s29 + $0xc] sm:$0xf]  ;;  %v566_v4 = vld [vmem:[%s2769_s29 + $0x10] sm:$0xf]  ;;  %v567_v5 = vld [vmem:[%s2769_s29 + $0x14] sm:$0xf] }
  0x25   : > { %v568_v6 = vld [vmem:[%s2769_s29 + $0x18] sm:$0xf]  ;;  %v610_v7 = vsel %vm609_vm0, %v562_v0, 0.0  ;;  %v617_v8 = vsel %vm609_vm0, %v563_v1, 0.0  ;;  %v569_v9 = vld [vmem:[%s2769_s29 + $0x1c] sm:$0xf] }
  0x26   : > { %v611_v10 = vrot.slane %v610_v7, 4  ;;  %v618_v11 = vrot.slane %v617_v8, 4  ;;  %v624_v12 = vsel %vm609_vm0, %v564_v2, 0.0  ;;  %v631_v13 = vsel %vm609_vm0, %v565_v3, 0.0  ;;  %v570_v58 = vld [vmem:[%s2769_s29 + $0x20] sm:$0xf] }
  0x27   : > { %v625_v14 = vrot.slane %v624_v12, 4  ;;  %v632_v15 = vrot.slane %v631_v13, 4  ;;  %v638_v16 = vsel %vm609_vm0, %v566_v4, 0.0  ;;  %v645_v17 = vsel %vm609_vm0, %v567_v5, 0.0  ;;  %v571_v59 = vld [vmem:[%s2769_s29 + $0x24] sm:$0xf] }
  0x28   : > { %v612_v18 = vadd.f32 %v611_v10, %v610_v7  ;;  %v619_v19 = vadd.f32 %v618_v11, %v617_v8  ;;  %v639_v20 = vrot.slane %v638_v16, 4  ;;  %v646_v21 = vrot.slane %v645_v17, 4  ;;  %v572_v0 = vld [vmem:[%s2769_s29 + $0x28] sm:$0xf]  ;;  %v573_v1 = vld [vmem:[%s2769_s29 + $0x2c] sm:$0xf] }
  0x29   : > { %v626_v22 = vadd.f32 %v625_v14, %v624_v12  ;;  %v633_v23 = vadd.f32 %v632_v15, %v631_v13  ;;  %v652_v24 = vsel %vm609_vm0, %v568_v6, 0.0  ;;  %v659_v25 = vsel %vm609_vm0, %v569_v9, 0.0  ;;  %v574_v9 = vld [vmem:[%s2769_s29 + $0x30] sm:$0xf]  ;;  %v575_v10 = vld [vmem:[%s2769_s29 + $0x34] sm:$0xf] }
  0x2a   : > { %v613_v26 = vrot.slane %v612_v18, 2  ;;  %v620_v27 = vrot.slane %v619_v19, 2  ;;  %v640_v28 = vadd.f32 %v639_v20, %v638_v16  ;;  %v647_v29 = vadd.f32 %v646_v21, %v645_v17  ;;  %v576_v17 = vld [vmem:[%s2769_s29 + $0x38] sm:$0xf] }
  0x2b   : > { %v627_v30 = vrot.slane %v626_v22, 2  ;;  %v634_v31 = vrot.slane %v633_v23, 2  ;;  %v653_v32 = vrot.slane %v652_v24, 4  ;;  %v660_v33 = vrot.slane %v659_v25, 4 }
  0x2c   : > { %v614_v34 = vadd.f32 %v613_v26, %v612_v18  ;;  %v621_v35 = vadd.f32 %v620_v27, %v619_v19  ;;  %v641_v36 = vrot.slane %v640_v28, 2  ;;  %v648_v37 = vrot.slane %v647_v29, 2  ;;  %v577_v26 = vld [vmem:[%s2769_s29 + $0x3c] sm:$0xf] }
  0x2d   : > { %v628_v38 = vadd.f32 %v627_v30, %v626_v22  ;;  %v635_v39 = vadd.f32 %v634_v31, %v633_v23  ;;  %v654_v40 = vadd.f32 %v653_v32, %v652_v24  ;;  %v661_v41 = vadd.f32 %v660_v33, %v659_v25 }
  0x2e   : > { %v615_v42 = vrot.slane %v614_v34, 1  ;;  %v622_v43 = vrot.slane %v621_v35, 1  ;;  %v642_v44 = vadd.f32 %v641_v36, %v640_v28  ;;  %v649_v45 = vadd.f32 %v648_v37, %v647_v29 }
  0x2f   : > { %v629_v46 = vrot.slane %v628_v38, 1  ;;  %v636_v47 = vrot.slane %v635_v39, 1  ;;  %v655_v48 = vrot.slane %v654_v40, 2  ;;  %v662_v49 = vrot.slane %v661_v41, 2 }
  0x30   : > { %v616_v50 = vadd.f32 %v615_v42, %v614_v34  ;;  %v623_v51 = vadd.f32 %v622_v43, %v621_v35  ;;  %v643_v52 = vrot.slane %v642_v44, 1  ;;  %v650_v53 = vrot.slane %v649_v45, 1 }
  0x31   : > { %v630_v54 = vadd.f32 %v629_v46, %v628_v38  ;;  %v637_v55 = vadd.f32 %v636_v47, %v635_v39  ;;  %v656_v56 = vadd.f32 %v655_v48, %v654_v40  ;;  %v663_v57 = vadd.f32 %v662_v49, %v661_v41 }
  0x32   : > { %v644_v60 = vadd.f32 %v643_v52, %v642_v44  ;;  %v651_v61 = vadd.f32 %v650_v53, %v649_v45  ;;  %v835_v62 = vmul.f32 0.25, %v616_v50  ;;  %v836_v63 = vmul.f32 0.25, %v623_v51 }
  0x33   : > { %v657_v2 = vrot.slane %v656_v56, 1  ;;  %v664_v3 = vrot.slane %v663_v57, 1  ;;  %v837_v4 = vmul.f32 0.25, %v630_v54  ;;  %v838_v5 = vmul.f32 0.25, %v637_v55 }
  0x34   : > { %v839_v6 = vmul.f32 0.25, %v644_v60  ;;  %v840_v7 = vmul.f32 0.25, %v651_v61  ;;  %v900_v8 = vsel %vm899_vm1, %v836_v63, %v835_v62  ;;  %v666_v11 = vsel %vm609_vm0, %v570_v58, 0.0  ;;  %v578_v62 = vld [vmem:[%s2769_s29 + $0x40] sm:$0xf] }
  0x35   : > { %v658_v12 = vadd.f32 %v657_v2, %v656_v56  ;;  %v665_v13 = vadd.f32 %v664_v3, %v663_v57  ;;  %v902_v14 = vsel %vm901_vm2, %v837_v4, %v900_v8  ;;  %v667_v15 = vrot.slane %v666_v11, 4 }
  0x36   : > { %v904_v16 = vsel %vm903_vm3, %v838_v5, %v902_v14  ;;  %v673_v18 = vsel %vm609_vm0, %v571_v59, 0.0  ;;  %v680_v19 = vsel %vm609_vm0, %v572_v0, 0.0  ;;  %v687_v20 = vsel %vm609_vm0, %v573_v1, 0.0 }
  0x37   : > { %v841_v21 = vmul.f32 0.25, %v658_v12  ;;  %v842_v22 = vmul.f32 0.25, %v665_v13  ;;  %v906_v23 = vsel %vm905_vm4, %v839_v6, %v904_v16  ;;  %v668_v24 = vadd.f32 %v667_v15, %v666_v11  ;;  %v580_v11 = vld [vmem:[%s2769_s29 + $0x48] sm:$0xf] }
  0x38   : > { %v908_v25 = vsel %vm907_vm5, %v840_v7, %v906_v23  ;;  %v674_v27 = vrot.slane %v673_v18, 4  ;;  %v681_v28 = vrot.slane %v680_v19, 4  ;;  %v688_v29 = vrot.slane %v687_v20, 4  ;;  %v579_v7 = vld [vmem:[%s2769_s29 + $0x44] sm:$0xf] }
  0x39   : > { %v910_v30 = vsel %vm909_vm6, %v841_v21, %v908_v25  ;;  %v669_v31 = vrot.slane %v668_v24, 2  ;;  %v694_v32 = vsel %vm609_vm0, %v574_v9, 0.0  ;;  %v701_v33 = vsel %vm609_vm0, %v575_v10, 0.0  ;;  %v581_v23 = vld [vmem:[%s2769_s29 + $0x4c] sm:$0xf] }
  0x3a   : > { %v912_v34 = vsel %vm911_vm7, %v842_v22, %v910_v30  ;;  %v675_v35 = vadd.f32 %v674_v27, %v673_v18  ;;  %v682_v36 = vadd.f32 %v681_v28, %v680_v19  ;;  %v689_v37 = vadd.f32 %v688_v29, %v687_v20 }
  0x3b   : > { %938 = vxpose.xlu0.b32.start [1/4] (short) (narrow) %v912_v34, 8  ;;  %v670_v38 = vadd.f32 %v669_v31, %v668_v24  ;;  %v695_v39 = vrot.slane %v694_v32, 4  ;;  %v702_v40 = vrot.slane %v701_v33, 4  ;;  %v708_v41 = vsel %vm609_vm0, %v576_v17, 0.0 }
  0x3c   : > { %v676_v42 = vrot.slane %v675_v35, 2  ;;  %v683_v43 = vrot.slane %v682_v36, 2  ;;  %v690_v44 = vrot.slane %v689_v37, 2  ;;  %v709_v45 = vrot.slane %v708_v41, 4 }
  0x3d   : > { %v671_v46 = vrot.slane %v670_v38, 1  ;;  %v696_v47 = vadd.f32 %v695_v39, %v694_v32  ;;  %v703_v48 = vadd.f32 %v702_v40, %v701_v33  ;;  %v715_v49 = vsel %vm609_vm0, %v577_v26, 0.0  ;;  %v582_v32 = vld [vmem:[%s2769_s29 + $0x50] sm:$0xf]  ;;  %v583_v40 = vld [vmem:[%s2769_s29 + $0x54] sm:$0xf] }
  0x3e   : > { %v677_v50 = vadd.f32 %v676_v42, %v675_v35  ;;  %v684_v51 = vadd.f32 %v683_v43, %v682_v36  ;;  %v691_v52 = vadd.f32 %v690_v44, %v689_v37  ;;  %v710_v53 = vadd.f32 %v709_v45, %v708_v41  ;;  %v584_v41 = vld [vmem:[%s2769_s29 + $0x58] sm:$0xf] }
  0x3f   : > { %v672_v54 = vadd.f32 %v671_v46, %v670_v38  ;;  %v697_v55 = vrot.slane %v696_v47, 2  ;;  %v704_v56 = vrot.slane %v703_v48, 2  ;;  %v716_v57 = vrot.slane %v715_v49, 4 }
  0x40   : > { %v678_v58 = vrot.slane %v677_v50, 1  ;;  %v685_v59 = vrot.slane %v684_v51, 1  ;;  %v692_v60 = vrot.slane %v691_v52, 1  ;;  %v711_v61 = vrot.slane %v710_v53, 2 }
  0x41   : > { %v698_v63 = vadd.f32 %v697_v55, %v696_v47  ;;  %v705_v0 = vadd.f32 %v704_v56, %v703_v48  ;;  %v717_v1 = vadd.f32 %v716_v57, %v715_v49  ;;  %v843_v2 = vmul.f32 0.25, %v672_v54  ;;  %v585_v49 = vld [vmem:[%s2769_s29 + $0x5c] sm:$0xf] }
  0x42   : > { %v679_v3 = vadd.f32 %v678_v58, %v677_v50  ;;  %v686_v4 = vadd.f32 %v685_v59, %v684_v51  ;;  %v693_v5 = vadd.f32 %v692_v60, %v691_v52  ;;  %v712_v6 = vadd.f32 %v711_v61, %v710_v53 }
  0x43   : > { %v699_v8 = vrot.slane %v698_v63, 1  ;;  %v706_v9 = vrot.slane %v705_v0, 1  ;;  %v718_v10 = vrot.slane %v717_v1, 2  ;;  %v722_v12 = vsel %vm609_vm0, %v578_v62, 0.0 }
  0x44   : > { %v713_v13 = vrot.slane %v712_v6, 1  ;;  %v844_v14 = vmul.f32 0.25, %v679_v3  ;;  %v845_v15 = vmul.f32 0.25, %v686_v4  ;;  %v846_v16 = vmul.f32 0.25, %v693_v5 }
  0x45   : > { %v700_v17 = vadd.f32 %v699_v8, %v698_v63  ;;  %v707_v18 = vadd.f32 %v706_v9, %v705_v0  ;;  %v719_v19 = vadd.f32 %v718_v10, %v717_v1  ;;  %v723_v20 = vrot.slane %v722_v12, 4  ;;  %v586_v10 = vld [vmem:[%s2769_s29 + $0x60] sm:$0xf] }
  0x46   : > { %v714_v21 = vadd.f32 %v713_v13, %v712_v6  ;;  %v913_v22 = vsel %vm899_vm1, %v844_v14, %v843_v2  ;;  %v729_v24 = vsel %vm609_vm0, %v579_v7, 0.0  ;;  %v736_v25 = vsel %vm609_vm0, %v580_v11, 0.0 }
  0x47   : > { %v720_v26 = vrot.slane %v719_v19, 1  ;;  %v847_v27 = vmul.f32 0.25, %v700_v17  ;;  %v848_v28 = vmul.f32 0.25, %v707_v18  ;;  %v914_v29 = vsel %vm901_vm2, %v845_v15, %v913_v22 }
  0x48   : > { %v849_v30 = vmul.f32 0.25, %v714_v21  ;;  %v915_v31 = vsel %vm903_vm3, %v846_v16, %v914_v29  ;;  %v724_v33 = vadd.f32 %v723_v20, %v722_v12  ;;  %v730_v34 = vrot.slane %v729_v24, 4 }
  0x49   : > { %v721_v35 = vadd.f32 %v720_v26, %v719_v19  ;;  %v916_v36 = vsel %vm905_vm4, %v847_v27, %v915_v31  ;;  %v737_v37 = vrot.slane %v736_v25, 4  ;;  %v743_v38 = vsel %vm609_vm0, %v581_v23, 0.0  ;;  %v587_v27 = vld [vmem:[%s2769_s29 + $0x64] sm:$0xf] }
  0x4a   : > { %v917_v39 = vsel %vm907_vm5, %v848_v28, %v916_v36  ;;  %v725_v42 = vrot.slane %v724_v33, 2  ;;  %v731_v43 = vadd.f32 %v730_v34, %v729_v24  ;;  %v744_v44 = vrot.slane %v743_v38, 4  ;;  %v588_v36 = vld [vmem:[%s2769_s29 + $0x68] sm:$0xf] }
  0x4b   : > { %v850_v45 = vmul.f32 0.25, %v721_v35  ;;  %v918_v46 = vsel %vm909_vm6, %v849_v30, %v917_v39  ;;  %v738_v47 = vadd.f32 %v737_v37, %v736_v25  ;;  %v750_v48 = vsel %vm609_vm0, %v582_v32, 0.0  ;;  %v589_v37 = vld [vmem:[%s2769_s29 + $0x6c] sm:$0xf] }
  0x4c   : > { %v726_v50 = vadd.f32 %v725_v42, %v724_v33  ;;  %v732_v51 = vrot.slane %v731_v43, 2  ;;  %v745_v52 = vadd.f32 %v744_v44, %v743_v38  ;;  %v751_v53 = vrot.slane %v750_v48, 4 }
  0x4d   : > { %v919_v54 = vsel %vm911_vm7, %v850_v45, %v918_v46  ;;  %v739_v55 = vrot.slane %v738_v47, 2  ;;  %v757_v56 = vsel %vm609_vm0, %v583_v40, 0.0  ;;  %v764_v57 = vsel %vm609_vm0, %v584_v41, 0.0  ;;  %v590_v45 = vld [vmem:[%s2769_s29 + $0x70] sm:$0xf] }
  0x4e   : > { %939 = vxpose.xlu0.b32.cont [2/4] (short) (narrow) %v919_v54, 8  ;;  %v727_v58 = vrot.slane %v726_v50, 1  ;;  %v733_v59 = vadd.f32 %v732_v51, %v731_v43  ;;  %v746_v60 = vrot.slane %v745_v52, 2  ;;  %v752_v61 = vadd.f32 %v751_v53, %v750_v48 }
  0x4f   : > { %v740_v62 = vadd.f32 %v739_v55, %v738_v47  ;;  %v758_v63 = vrot.slane %v757_v56, 4  ;;  %v765_v0 = vrot.slane %v764_v57, 4  ;;  %v771_v1 = vsel %vm609_vm0, %v585_v49, 0.0  ;;  %v591_v55 = vld [vmem:[%s2769_s29 + $0x74] sm:$0xf] }
  0x50   : > { %v728_v2 = vadd.f32 %v727_v58, %v726_v50  ;;  %v734_v3 = vrot.slane %v733_v59, 1  ;;  %v747_v4 = vadd.f32 %v746_v60, %v745_v52  ;;  %v753_v5 = vrot.slane %v752_v61, 2 }
  0x51   : > { %v741_v6 = vrot.slane %v740_v62, 1  ;;  %v759_v7 = vadd.f32 %v758_v63, %v757_v56  ;;  %v766_v8 = vadd.f32 %v765_v0, %v764_v57  ;;  %v772_v9 = vrot.slane %v771_v1, 4 }
  0x52   : > { %v735_v11 = vadd.f32 %v734_v3, %v733_v59  ;;  %v748_v12 = vrot.slane %v747_v4, 1  ;;  %v754_v13 = vadd.f32 %v753_v5, %v752_v61  ;;  %v851_v14 = vmul.f32 0.25, %v728_v2  ;;  %v593_v2 = vld [vmem:[%s2769_s29 + $0x7c] sm:$0xf] }
  0x53   : > { %v742_v15 = vadd.f32 %v741_v6, %v740_v62  ;;  %v760_v16 = vrot.slane %v759_v7, 2  ;;  %v767_v17 = vrot.slane %v766_v8, 2  ;;  %v773_v18 = vadd.f32 %v772_v9, %v771_v1  ;;  %v592_v1 = vld [vmem:[%s2769_s29 + $0x78] sm:$0xf]  ;;  %s2450_s29 = smul.u32 192, %s2763_s18 }
  0x54   : > { %v749_v19 = vadd.f32 %v748_v12, %v747_v4  ;;  %v755_v20 = vrot.slane %v754_v13, 1  ;;  %v852_v21 = vmul.f32 0.25, %v735_v11  ;;  %v778_v22 = vsel %vm609_vm0, %v586_v10, 0.0 }
  0x55   : > { %v761_v23 = vadd.f32 %v760_v16, %v759_v7  ;;  %v768_v24 = vadd.f32 %v767_v17, %v766_v8  ;;  %v774_v25 = vrot.slane %v773_v18, 2  ;;  %v853_v26 = vmul.f32 0.25, %v742_v15  ;;  %s2879_s26 = scalar_lea.vmem %s3243_s1, %s2450_s29 }
  0x56   : > { %v756_v28 = vadd.f32 %v755_v20, %v754_v13  ;;  %v854_v29 = vmul.f32 0.25, %v749_v19  ;;  %v920_v30 = vsel %vm899_vm1, %v852_v21, %v851_v14  ;;  %v779_v31 = vrot.slane %v778_v22, 4 }
  0x57   : > { %v762_v32 = vrot.slane %v761_v23, 1  ;;  %v769_v33 = vrot.slane %v768_v24, 1  ;;  %v775_v34 = vadd.f32 %v774_v25, %v773_v18  ;;  %v921_v35 = vsel %vm901_vm2, %v853_v26, %v920_v30 }
  0x58   : > { %v855_v38 = vmul.f32 0.25, %v756_v28  ;;  %v922_v39 = vsel %vm903_vm3, %v854_v29, %v921_v35  ;;  %v780_v40 = vadd.f32 %v779_v31, %v778_v22  ;;  %v785_v41 = vsel %vm609_vm0, %v587_v27, 0.0 }
  0x59   : > { %v763_v42 = vadd.f32 %v762_v32, %v761_v23  ;;  %v770_v43 = vadd.f32 %v769_v33, %v768_v24  ;;  %v776_v44 = vrot.slane %v775_v34, 1  ;;  %v786_v46 = vrot.slane %v785_v41, 4 }
  0x5a   : > { %v923_v47 = vsel %vm905_vm4, %v855_v38, %v922_v39  ;;  %v781_v48 = vrot.slane %v780_v40, 2  ;;  %v792_v49 = vsel %vm609_vm0, %v588_v36, 0.0  ;;  %v799_v50 = vsel %vm609_vm0, %v589_v37, 0.0 }
  0x5b   : > { %v777_v51 = vadd.f32 %v776_v44, %v775_v34  ;;  %v856_v52 = vmul.f32 0.25, %v763_v42  ;;  %v857_v53 = vmul.f32 0.25, %v770_v43  ;;  %v787_v54 = vadd.f32 %v786_v46, %v785_v41 }
  0x5c   : > { %v782_v56 = vadd.f32 %v781_v48, %v780_v40  ;;  %v793_v57 = vrot.slane %v792_v49, 4  ;;  %v800_v58 = vrot.slane %v799_v50, 4  ;;  %v806_v59 = vsel %vm609_vm0, %v590_v45, 0.0 }
  0x5d   : > { %v858_v60 = vmul.f32 0.25, %v777_v51  ;;  %v924_v61 = vsel %vm907_vm5, %v856_v52, %v923_v47  ;;  %v788_v62 = vrot.slane %v787_v54, 2  ;;  %v807_v63 = vrot.slane %v806_v59, 4 }
  0x5e   : > { %v925_v0 = vsel %vm909_vm6, %v857_v53, %v924_v61  ;;  %v783_v3 = vrot.slane %v782_v56, 1  ;;  %v794_v4 = vadd.f32 %v793_v57, %v792_v49  ;;  %v801_v5 = vadd.f32 %v800_v58, %v799_v50  ;;  %v2497_v49 = vld [vmem:[%s3242_s2 + $0x8] sm:$0xff]  }
  0x5f   : > { %v926_v6 = vsel %vm911_vm7, %v858_v60, %v925_v0  ;;  %v789_v7 = vadd.f32 %v788_v62, %v787_v54  ;;  %v808_v8 = vadd.f32 %v807_v63, %v806_v59  ;;  %v813_v9 = vsel %vm609_vm0, %v591_v55, 0.0  ;;  %v1264_v63 = vld [vmem:[%s2879_s26] sm:$0x7]  ;;  %v1265_v0 = vld [vmem:[%s2879_s26 + $0x4] sm:$0x7] }
  0x60   : > { %940 = vxpose.xlu0.b32.cont [3/4] (short) (narrow) %v926_v6, 8  ;;  %v784_v10 = vadd.f32 %v783_v3, %v782_v56  ;;  %v795_v11 = vrot.slane %v794_v4, 2  ;;  %v802_v12 = vrot.slane %v801_v5, 2  ;;  %v814_v13 = vrot.slane %v813_v9, 4  ;;  %v2498_v56 = vld [vmem:[%s3242_s2] sm:$0xff]   ;;  %s3131_s2 = sand.u32 1, %s2614_s22  }
  0x61   : > { %v790_v14 = vrot.slane %v789_v7, 1  ;;  %v809_v15 = vrot.slane %v808_v8, 2  ;;  %v820_v16 = vsel %vm609_vm0, %v592_v1, 0.0  ;;  %v827_v17 = vsel %vm609_vm0, %v593_v2, 0.0  ;;  %v1266_v1 = vld [vmem:[%s2879_s26 + $0x8] sm:$0x7] }
  0x62   : > { %v796_v18 = vadd.f32 %v795_v11, %v794_v4  ;;  %v803_v19 = vadd.f32 %v802_v12, %v801_v5  ;;  %v815_v20 = vadd.f32 %v814_v13, %v813_v9  ;;  %v821_v21 = vrot.slane %v820_v16, 4  ;;  %v1267_v2 = vld [vmem:[%s2879_s26 + $0xc] sm:$0x7]  ;;  %v1268_v3 = vld [vmem:[%s2879_s26 + $0x10] sm:$0x7]  ;;  %s545_s20 = scalar_lea.vmem [#allocation4], %s3131_s2 }
  0x63   : > { %v791_v22 = vadd.f32 %v790_v14, %v789_v7  ;;  %v810_v23 = vadd.f32 %v809_v15, %v808_v8  ;;  %v828_v24 = vrot.slane %v827_v17, 4  ;;  %v859_v25 = vmul.f32 0.25, %v784_v10  ;;  %v1269_v4 = vld [vmem:[%s2879_s26 + $0x14] sm:$0x7]  ;;  %v1270_v5 = vld [vmem:[%s2879_s26 + $0x18] sm:$0x7] }
  0x64   : > { %v797_v26 = vrot.slane %v796_v18, 1  ;;  %v804_v27 = vrot.slane %v803_v19, 1  ;;  %v816_v28 = vrot.slane %v815_v20, 2  ;;  %v822_v29 = vadd.f32 %v821_v21, %v820_v16  ;;  %v1271_v6 = vld [vmem:[%s2879_s26 + $0x1c] sm:$0x7]  ;;  %s2183_s19 = scalar_lea.sflag [#allocation5], %s3131_s2 }
  0x65   : > { %v811_v30 = vrot.slane %v810_v23, 1  ;;  %v829_v31 = vadd.f32 %v828_v24, %v827_v17  ;;  %v860_v32 = vmul.f32 0.25, %v791_v22  ;;  %v2624_v52 = vmov 0.0  }
  0x66   : > { %v798_v33 = vadd.f32 %v797_v26, %v796_v18  ;;  %v805_v34 = vadd.f32 %v804_v27, %v803_v19  ;;  %v817_v35 = vadd.f32 %v816_v28, %v815_v20  ;;  %v823_v36 = vrot.slane %v822_v29, 2  ;;  %2396 = vmatprep.subr.bf16.mxu0 %v2624_v52  ;;  %2404 = vmatprep.subr.bf16.mxu1 %v2624_v52 }
  0x67   : > { %v812_v37 = vadd.f32 %v811_v30, %v810_v23  ;;  %v830_v38 = vrot.slane %v829_v31, 2  ;;  %v927_v39 = vsel %vm899_vm1, %v860_v32, %v859_v25  ;;  %2397 = vmatpush3.bf16.msra.mxu0 %v2497_v49  ;;  %2400 = vmatprep.mubr.msk.bf16.mxu0 %vm2625_vm8, %v2624_v52  ;;  %v1334_v7 = vsel %vm1333_vm9, %v1264_v63, 0.0 }
  0x68   : > { %v818_v40 = vrot.slane %v817_v35, 1  ;;  %v824_v41 = vadd.f32 %v823_v36, %v822_v29  ;;  %v861_v42 = vmul.f32 0.25, %v798_v33  ;;  %v862_v43 = vmul.f32 0.25, %v805_v34  ;;  %2398 = vmatprep.subr.bf16.mxu0 %v2624_v52  ;;  %2408 = vmatprep.mubr.msk.bf16.mxu1 %vm2625_vm8, %v2624_v52 }
  0x69   : > { %v831_v44 = vadd.f32 %v830_v38, %v829_v31  ;;  %v863_v45 = vmul.f32 0.25, %v812_v37  ;;  %v1341_v8 = vsel %vm1333_vm9, %v1265_v0, 0.0  ;;  %v1348_v9 = vsel %vm1333_vm9, %v1266_v1, 0.0 }
  0x6a   : > { %v819_v46 = vadd.f32 %v818_v40, %v817_v35  ;;  %v825_v47 = vrot.slane %v824_v41, 1  ;;  %v928_v48 = vsel %vm901_vm2, %v861_v42, %v927_v39  ;;  %v1355_v10 = vsel %vm1333_vm9, %v1267_v2, 0.0 }
  0x6b   : > { %v832_v50 = vrot.slane %v831_v44, 1  ;;  %v929_v51 = vsel %vm903_vm3, %v862_v43, %v928_v48  ;;  %2399 = vmatpush3.bf16.msra.mxu0 %v2498_v56  ;;  %v1335_v11 = vrot.slane %v1334_v7, 4  ;;  %v1342_v12 = vrot.slane %v1341_v8, 4  ;;  %v1272_v56 = vld [vmem:[%s2879_s26 + $0x20] sm:$0x7] }
  0x6c   : > { %v826_v53 = vadd.f32 %v825_v47, %v824_v41  ;;  %v864_v54 = vmul.f32 0.25, %v819_v46  ;;  %v930_v55 = vsel %vm905_vm4, %v863_v45, %v929_v51  ;;  %2412 = vmatprep.subr.bf16.mxu0 %v2624_v52  ;;  %v1349_v13 = vrot.slane %v1348_v9, 4 }
  0x6d   : > { %v833_v57 = vadd.f32 %v832_v50, %v831_v44  ;;  %v1356_v14 = vrot.slane %v1355_v10, 4  ;;  %v1362_v15 = vsel %vm1333_vm9, %v1268_v3, 0.0  ;;  %v1369_v16 = vsel %vm1333_vm9, %v1269_v4, 0.0 }
  0x6e   : > { %v865_v58 = vmul.f32 0.25, %v826_v53  ;;  %v931_v59 = vsel %vm907_vm5, %v864_v54, %v930_v55  ;;  %v1376_v17 = vsel %vm1333_vm9, %v1270_v5, 0.0  ;;  %v1383_v18 = vsel %vm1333_vm9, %v1271_v6, 0.0  ;;  %v1274_v5 = vld [vmem:[%s2879_s26 + $0x28] sm:$0x7] }
  0x6f   : > { %v866_v60 = vmul.f32 0.25, %v833_v57  ;;  %v1336_v19 = vadd.f32 %v1335_v11, %v1334_v7  ;;  %v1343_v20 = vadd.f32 %v1342_v12, %v1341_v8  ;;  %v1350_v21 = vadd.f32 %v1349_v13, %v1348_v9  ;;  %v1275_v6 = vld [vmem:[%s2879_s26 + $0x2c] sm:$0x7]  ;;  %v1276_v9 = vld [vmem:[%s2879_s26 + $0x30] sm:$0x7] }
  0x70   : > { %v932_v61 = vsel %vm909_vm6, %v865_v58, %v931_v59  ;;  %v1357_v22 = vadd.f32 %v1356_v14, %v1355_v10  ;;  %v1363_v23 = vrot.slane %v1362_v15, 4  ;;  %v1370_v24 = vrot.slane %v1369_v16, 4 }
  0x71   : > { %v933_v62 = vsel %vm911_vm7, %v866_v60, %v932_v61  ;;  %v1377_v25 = vrot.slane %v1376_v17, 4  ;;  %v1384_v26 = vrot.slane %v1383_v18, 4  ;;  %v1337_v27 = vrot.slane %v1336_v19, 2  ;;  %v1273_v61 = vld [vmem:[%s2879_s26 + $0x24] sm:$0x7] }
  0x72   : > { %941 = vxpose.xlu0.b32.end [4/4] (short) (narrow) %v933_v62, 8  ;;  %v1344_v28 = vrot.slane %v1343_v20, 2  ;;  %v1351_v29 = vrot.slane %v1350_v21, 2  ;;  %v1358_v30 = vrot.slane %v1357_v22, 2  ;;  %v1364_v31 = vadd.f32 %v1363_v23, %v1362_v15 }
  0x73   : > { %v1371_v32 = vadd.f32 %v1370_v24, %v1369_v16  ;;  %v1378_v33 = vadd.f32 %v1377_v25, %v1376_v17  ;;  %v1385_v34 = vadd.f32 %v1384_v26, %v1383_v18  ;;  %v1338_v35 = vadd.f32 %v1337_v27, %v1336_v19  ;;  %v1277_v18 = vld [vmem:[%s2879_s26 + $0x34] sm:$0x7]  ;;  %v1278_v26 = vld [vmem:[%s2879_s26 + $0x38] sm:$0x7] }
  0x74   : > { %v1345_v36 = vadd.f32 %v1344_v28, %v1343_v20  ;;  %v1352_v37 = vadd.f32 %v1351_v29, %v1350_v21  ;;  %v1359_v38 = vadd.f32 %v1358_v30, %v1357_v22  ;;  %v1365_v39 = vrot.slane %v1364_v31, 2 }
  0x75   : > { %v1372_v40 = vrot.slane %v1371_v32, 2  ;;  %v1379_v41 = vrot.slane %v1378_v33, 2  ;;  %v1386_v42 = vrot.slane %v1385_v34, 2  ;;  %v1339_v43 = vrot.slane %v1338_v35, 1 }
  0x76   : > { %v1346_v44 = vrot.slane %v1345_v36, 1  ;;  %v1353_v45 = vrot.slane %v1352_v37, 1  ;;  %v1360_v46 = vrot.slane %v1359_v38, 1  ;;  %v1366_v47 = vadd.f32 %v1365_v39, %v1364_v31 }
  0x77   : > { %v1373_v48 = vadd.f32 %v1372_v40, %v1371_v32  ;;  %v1380_v49 = vadd.f32 %v1379_v41, %v1378_v33  ;;  %v1387_v50 = vadd.f32 %v1386_v42, %v1385_v34  ;;  %v1340_v51 = vadd.f32 %v1339_v43, %v1338_v35  ;;  %v1279_v35 = vld [vmem:[%s2879_s26 + $0x3c] sm:$0x7] }
  0x78   : > { %v1347_v53 = vadd.f32 %v1346_v44, %v1345_v36  ;;  %v1354_v54 = vadd.f32 %v1353_v45, %v1352_v37  ;;  %v1361_v55 = vadd.f32 %v1360_v46, %v1359_v38  ;;  %v1367_v57 = vrot.slane %v1366_v47, 1 }
  0x79   : > { %v1374_v58 = vrot.slane %v1373_v48, 1  ;;  %v1381_v59 = vrot.slane %v1380_v49, 1  ;;  %v1388_v60 = vrot.slane %v1387_v50, 1  ;;  %v1671_v62 = vmul.f32 0.33333334, %v1340_v51 }
  0x7a   : > { %v1672_v63 = vmul.f32 0.33333334, %v1347_v53  ;;  %v1673_v0 = vmul.f32 0.33333334, %v1354_v54  ;;  %v1368_v1 = vadd.f32 %v1367_v57, %v1366_v47  ;;  %v1674_v7 = vmul.f32 0.33333334, %v1361_v55 }
  0x7b   : > { %v1375_v2 = vadd.f32 %v1374_v58, %v1373_v48  ;;  %v1382_v3 = vadd.f32 %v1381_v59, %v1380_v49  ;;  %v1389_v4 = vadd.f32 %v1388_v60, %v1387_v50  ;;  %v1390_v10 = vsel %vm1333_vm9, %v1272_v56, 0.0 }
  0x7c   : > { %v1767_v8 = vsel %vm899_vm1, %v1672_v63, %v1671_v62  ;;  %v1397_v11 = vsel %vm1333_vm9, %v1273_v61, 0.0  ;;  %v1675_v12 = vmul.f32 0.33333334, %v1368_v1  ;;  %v1391_v19 = vrot.slane %v1390_v10, 4 }
  0x7d   : > { %v1676_v13 = vmul.f32 0.33333334, %v1375_v2  ;;  %v1677_v14 = vmul.f32 0.33333334, %v1382_v3  ;;  %v1768_v15 = vsel %vm901_vm2, %v1673_v0, %v1767_v8  ;;  %v1678_v16 = vmul.f32 0.33333334, %v1389_v4 }
  0x7e   : > { %v1769_v17 = vsel %vm903_vm3, %v1674_v7, %v1768_v15  ;;  %v1398_v20 = vrot.slane %v1397_v11, 4  ;;  %v1404_v22 = vsel %vm1333_vm9, %v1274_v5, 0.0  ;;  %v1411_v23 = vsel %vm1333_vm9, %v1275_v6, 0.0  ;;  %v1280_v4 = vld [vmem:[%s2879_s26 + $0x40] sm:$0x7] }
  0x7f   : > { %v1770_v21 = vsel %vm905_vm4, %v1675_v12, %v1769_v17  ;;  %v1418_v24 = vsel %vm1333_vm9, %v1276_v9, 0.0  ;;  %v1392_v27 = vadd.f32 %v1391_v19, %v1390_v10  ;;  %v1405_v29 = vrot.slane %v1404_v22, 4 }
  0x80   : > { %v1771_v25 = vsel %vm907_vm5, %v1676_v13, %v1770_v21  ;;  %v1399_v28 = vadd.f32 %v1398_v20, %v1397_v11  ;;  %v1412_v31 = vrot.slane %v1411_v23, 4  ;;  %v1419_v32 = vrot.slane %v1418_v24, 4  ;;  %v1281_v13 = vld [vmem:[%s2879_s26 + $0x44] sm:$0x7] }
  0x81   : > { %v1772_v30 = vsel %vm909_vm6, %v1677_v14, %v1771_v25  ;;  %v1425_v33 = vsel %vm1333_vm9, %v1277_v18, 0.0  ;;  %v1393_v36 = vrot.slane %v1392_v27, 2  ;;  %v1406_v38 = vadd.f32 %v1405_v29, %v1404_v22  ;;  %v1282_v22 = vld [vmem:[%s2879_s26 + $0x48] sm:$0x7]  ;;  %v1283_v25 = vld [vmem:[%s2879_s26 + $0x4c] sm:$0x7] }
  0x82   : > { %v1773_v34 = vsel %vm911_vm7, %v1678_v16, %v1772_v30  ;;  %v1400_v37 = vrot.slane %v1399_v28, 2  ;;  %v1413_v39 = vadd.f32 %v1412_v31, %v1411_v23  ;;  %v1420_v40 = vadd.f32 %v1419_v32, %v1418_v24  ;;  %v1284_v31 = vld [vmem:[%s2879_s26 + $0x50] sm:$0x7] }
  0x83   : > { %1815 = vxpose.xlu1.b32.start [1/6] (short) (narrow) %v1773_v34, 8  ;;  %v1426_v41 = vrot.slane %v1425_v33, 4  ;;  %v1432_v42 = vsel %vm1333_vm9, %v1278_v26, 0.0  ;;  %v1394_v43 = vadd.f32 %v1393_v36, %v1392_v27  ;;  %v1407_v45 = vrot.slane %v1406_v38, 2 }
  0x84   : > { %v1401_v44 = vadd.f32 %v1400_v37, %v1399_v28  ;;  %v1433_v46 = vrot.slane %v1432_v42, 4  ;;  %v1414_v47 = vrot.slane %v1413_v39, 2  ;;  %v1421_v48 = vrot.slane %v1420_v40, 2 }
  0x85   : > { %v1427_v49 = vadd.f32 %v1426_v41, %v1425_v33  ;;  %v1439_v50 = vsel %vm1333_vm9, %v1279_v35, 0.0  ;;  %v1395_v51 = vrot.slane %v1394_v43, 1  ;;  %v1408_v54 = vadd.f32 %v1407_v45, %v1406_v38 }
  0x86   : > { %v1402_v53 = vrot.slane %v1401_v44, 1  ;;  %v1434_v55 = vadd.f32 %v1433_v46, %v1432_v42  ;;  %v1415_v56 = vadd.f32 %v1414_v47, %v1413_v39  ;;  %v1422_v57 = vadd.f32 %v1421_v48, %v1420_v40  ;;  %v1285_v39 = vld [vmem:[%s2879_s26 + $0x54] sm:$0x7]  ;;  %v1286_v40 = vld [vmem:[%s2879_s26 + $0x58] sm:$0x7] }
  0x87   : > { %v1428_v58 = vrot.slane %v1427_v49, 2  ;;  %v1440_v59 = vrot.slane %v1439_v50, 4  ;;  %v1396_v60 = vadd.f32 %v1395_v51, %v1394_v43  ;;  %v1409_v62 = vrot.slane %v1408_v54, 1  ;;  %v1287_v51 = vld [vmem:[%s2879_s26 + $0x5c] sm:$0x7] }
  0x88   : > { %v1403_v61 = vadd.f32 %v1402_v53, %v1401_v44  ;;  %v1435_v63 = vrot.slane %v1434_v55, 2  ;;  %v1416_v0 = vrot.slane %v1415_v56, 1  ;;  %v1423_v1 = vrot.slane %v1422_v57, 1 }
  0x89   : > { %v1429_v2 = vadd.f32 %v1428_v58, %v1427_v49  ;;  %v1441_v3 = vadd.f32 %v1440_v59, %v1439_v50  ;;  %v1410_v5 = vadd.f32 %v1409_v62, %v1408_v54  ;;  %v1679_v7 = vmul.f32 0.33333334, %v1396_v60 }
  0x8a   : > { %v1436_v6 = vadd.f32 %v1435_v63, %v1434_v55  ;;  %v1680_v8 = vmul.f32 0.33333334, %v1403_v61  ;;  %v1417_v9 = vadd.f32 %v1416_v0, %v1415_v56  ;;  %v1424_v10 = vadd.f32 %v1423_v1, %v1422_v57 }
  0x8b   : > { %v1430_v11 = vrot.slane %v1429_v2, 1  ;;  %v1442_v12 = vrot.slane %v1441_v3, 2  ;;  %v1681_v15 = vmul.f32 0.33333334, %v1410_v5  ;;  %v1446_v17 = vsel %vm1333_vm9, %v1280_v4, 0.0 }
  0x8c   : > { %v1437_v14 = vrot.slane %v1436_v6, 1  ;;  %v1774_v16 = vsel %vm899_vm1, %v1680_v8, %v1679_v7  ;;  %v1682_v20 = vmul.f32 0.33333334, %v1417_v9  ;;  %v1683_v21 = vmul.f32 0.33333334, %v1424_v10 }
  0x8d   : > { %v1431_v18 = vadd.f32 %v1430_v11, %v1429_v2  ;;  %v1443_v19 = vadd.f32 %v1442_v12, %v1441_v3  ;;  %v1775_v24 = vsel %vm901_vm2, %v1681_v15, %v1774_v16  ;;  %v1447_v26 = vrot.slane %v1446_v17, 4 }
  0x8e   : > { %v1438_v23 = vadd.f32 %v1437_v14, %v1436_v6  ;;  %v1453_v27 = vsel %vm1333_vm9, %v1281_v13, 0.0  ;;  %v1776_v30 = vsel %vm903_vm3, %v1682_v20, %v1775_v24  ;;  %v1460_v36 = vsel %vm1333_vm9, %v1282_v22, 0.0  ;;  %v1288_v13 = vld [vmem:[%s2879_s26 + $0x60] sm:$0x7] }
  0x8f   : > { %v1444_v28 = vrot.slane %v1443_v19, 1  ;;  %v1684_v29 = vmul.f32 0.33333334, %v1431_v18  ;;  %v1454_v32 = vrot.slane %v1453_v27, 4  ;;  %v1777_v34 = vsel %vm905_vm4, %v1683_v21, %v1776_v30 }
  0x90   : > { %v1685_v33 = vmul.f32 0.33333334, %v1438_v23  ;;  %v1448_v35 = vadd.f32 %v1447_v26, %v1446_v17  ;;  %v1461_v42 = vrot.slane %v1460_v36, 4  ;;  %v1467_v45 = vsel %vm1333_vm9, %v1283_v25, 0.0  ;;  %v1289_v25 = vld [vmem:[%s2879_s26 + $0x64] sm:$0x7] }
  0x91   : > { %v1445_v37 = vadd.f32 %v1444_v28, %v1443_v19  ;;  %v1778_v38 = vsel %vm907_vm5, %v1684_v29, %v1777_v34  ;;  %v1455_v41 = vadd.f32 %v1454_v32, %v1453_v27  ;;  %v1474_v46 = vsel %vm1333_vm9, %v1284_v31, 0.0  ;;  %v1290_v34 = vld [vmem:[%s2879_s26 + $0x68] sm:$0x7] }
  0x92   : > { %v1779_v43 = vsel %vm909_vm6, %v1685_v33, %v1778_v38  ;;  %v1449_v44 = vrot.slane %v1448_v35, 2  ;;  %v1462_v49 = vadd.f32 %v1461_v42, %v1460_v36  ;;  %v1468_v50 = vrot.slane %v1467_v45, 4 }
  0x93   : > { %v1686_v47 = vmul.f32 0.33333334, %v1445_v37  ;;  %v1456_v48 = vrot.slane %v1455_v41, 2  ;;  %v1475_v54 = vrot.slane %v1474_v46, 4  ;;  %v1481_v55 = vsel %vm1333_vm9, %v1285_v39, 0.0 }
  0x94   : > { %v1450_v53 = vadd.f32 %v1449_v44, %v1448_v35  ;;  %v1488_v56 = vsel %vm1333_vm9, %v1286_v40, 0.0  ;;  %v1463_v59 = vrot.slane %v1462_v49, 2  ;;  %v1469_v60 = vadd.f32 %v1468_v50, %v1467_v45 }
  0x95   : > { %v1780_v57 = vsel %vm911_vm7, %v1686_v47, %v1779_v43  ;;  %v1457_v58 = vadd.f32 %v1456_v48, %v1455_v41  ;;  %v1476_v62 = vadd.f32 %v1475_v54, %v1474_v46  ;;  %v1482_v63 = vrot.slane %v1481_v55, 4  ;;  %v1291_v43 = vld [vmem:[%s2879_s26 + $0x6c] sm:$0x7]  ;;  %v1292_v47 = vld [vmem:[%s2879_s26 + $0x70] sm:$0x7] }
  0x96   : > { %1816 = vxpose.xlu1.b32.cont [2/6] (short) (narrow) %v1780_v57, 8  ;;  %v1451_v61 = vrot.slane %v1450_v53, 1  ;;  %v1489_v0 = vrot.slane %v1488_v56, 4  ;;  %v1464_v2 = vadd.f32 %v1463_v59, %v1462_v49  ;;  %v1470_v3 = vrot.slane %v1469_v60, 2 }
  0x97   : > { %v1458_v1 = vrot.slane %v1457_v58, 1  ;;  %v1495_v4 = vsel %vm1333_vm9, %v1287_v51, 0.0  ;;  %v1477_v6 = vrot.slane %v1476_v62, 2  ;;  %v1483_v7 = vadd.f32 %v1482_v63, %v1481_v55 }
  0x98   : > { %v1452_v5 = vadd.f32 %v1451_v61, %v1450_v53  ;;  %v1490_v8 = vadd.f32 %v1489_v0, %v1488_v56  ;;  %v1465_v10 = vrot.slane %v1464_v2, 1  ;;  %v1471_v11 = vadd.f32 %v1470_v3, %v1469_v60  ;;  %v1293_v56 = vld [vmem:[%s2879_s26 + $0x74] sm:$0x7] }
  0x99   : > { %v1459_v9 = vadd.f32 %v1458_v1, %v1457_v58  ;;  %v1496_v12 = vrot.slane %v1495_v4, 4  ;;  %v1478_v14 = vadd.f32 %v1477_v6, %v1476_v62  ;;  %v1484_v15 = vrot.slane %v1483_v7, 2 }
  0x9a   : > { %v1491_v16 = vrot.slane %v1490_v8, 2  ;;  %v1687_v17 = vmul.f32 0.33333334, %v1452_v5  ;;  %v1466_v18 = vadd.f32 %v1465_v10, %v1464_v2  ;;  %v1472_v19 = vrot.slane %v1471_v11, 1  ;;  %v1294_v2 = vld [vmem:[%s2879_s26 + $0x78] sm:$0x7] }
  0x9b   : > { %v1497_v20 = vadd.f32 %v1496_v12, %v1495_v4  ;;  %v1688_v21 = vmul.f32 0.33333334, %v1459_v9  ;;  %v1479_v22 = vrot.slane %v1478_v14, 1  ;;  %v1485_v23 = vadd.f32 %v1484_v15, %v1483_v7  ;;  %v1295_v10 = vld [vmem:[%s2879_s26 + $0x7c] sm:$0x7] }
  0x9c   : > { %v1492_v24 = vadd.f32 %v1491_v16, %v1490_v8  ;;  %v1502_v26 = vsel %vm1333_vm9, %v1288_v13, 0.0  ;;  %v1473_v27 = vadd.f32 %v1472_v19, %v1471_v11  ;;  %v1689_v29 = vmul.f32 0.33333334, %v1466_v18 }
  0x9d   : > { %v1498_v28 = vrot.slane %v1497_v20, 2  ;;  %v1781_v30 = vsel %vm899_vm1, %v1688_v21, %v1687_v17  ;;  %v1480_v31 = vadd.f32 %v1479_v22, %v1478_v14  ;;  %v1486_v32 = vrot.slane %v1485_v23, 1  ;;  %v1296_v22 = vld [vmem:[%s2879_s26 + $0x80] sm:$0x7] }
  0x9e   : > { %v1493_v33 = vrot.slane %v1492_v24, 1  ;;  %v1503_v35 = vrot.slane %v1502_v26, 4  ;;  %v1690_v37 = vmul.f32 0.33333334, %v1473_v27  ;;  %v1782_v38 = vsel %vm901_vm2, %v1689_v29, %v1781_v30 }
  0x9f   : > { %v1499_v36 = vadd.f32 %v1498_v28, %v1497_v20  ;;  %v1509_v39 = vsel %vm1333_vm9, %v1289_v25, 0.0  ;;  %v1487_v40 = vadd.f32 %v1486_v32, %v1485_v23  ;;  %v1691_v42 = vmul.f32 0.33333334, %v1480_v31 }
  0xa0   : > { %v1494_v41 = vadd.f32 %v1493_v33, %v1492_v24  ;;  %v1504_v44 = vadd.f32 %v1503_v35, %v1502_v26  ;;  %v1783_v46 = vsel %vm903_vm3, %v1690_v37, %v1782_v38  ;;  %v1510_v48 = vrot.slane %v1509_v39, 4 }
  0xa1   : > { %v1500_v45 = vrot.slane %v1499_v36, 1  ;;  %v1516_v49 = vsel %vm1333_vm9, %v1290_v34, 0.0  ;;  %v1692_v50 = vmul.f32 0.33333334, %v1487_v40  ;;  %v1784_v53 = vsel %vm905_vm4, %v1691_v42, %v1783_v46  ;;  %v1297_v42 = vld [vmem:[%s2879_s26 + $0x84] sm:$0x7] }
  0xa2   : > { %v1693_v51 = vmul.f32 0.33333334, %v1494_v41  ;;  %v1505_v54 = vrot.slane %v1504_v44, 2  ;;  %v1511_v57 = vadd.f32 %v1510_v48, %v1509_v39  ;;  %v1517_v58 = vrot.slane %v1516_v49, 4 }
  0xa3   : > { %v1501_v55 = vadd.f32 %v1500_v45, %v1499_v36  ;;  %v1523_v59 = vsel %vm1333_vm9, %v1291_v43, 0.0  ;;  %v1785_v60 = vsel %vm907_vm5, %v1692_v50, %v1784_v53  ;;  %v1530_v63 = vsel %vm1333_vm9, %v1292_v47, 0.0 }
  0xa4   : > { %v1506_v61 = vadd.f32 %v1505_v54, %v1504_v44  ;;  %v1524_v62 = vrot.slane %v1523_v59, 4  ;;  %v1786_v1 = vsel %vm909_vm6, %v1693_v51, %v1785_v60  ;;  %v1512_v3 = vrot.slane %v1511_v57, 2  ;;  %v1298_v51 = vld [vmem:[%s2879_s26 + $0x88] sm:$0x7] }
  0xa5   : > { %v1694_v0 = vmul.f32 0.33333334, %v1501_v55  ;;  %v1518_v4 = vadd.f32 %v1517_v58, %v1516_v49  ;;  %v1531_v7 = vrot.slane %v1530_v63, 4  ;;  %v1537_v8 = vsel %vm1333_vm9, %v1293_v56, 0.0 }
  0xa6   : > { %v1507_v5 = vrot.slane %v1506_v61, 1  ;;  %v1525_v6 = vadd.f32 %v1524_v62, %v1523_v59  ;;  %v1513_v11 = vadd.f32 %v1512_v3, %v1511_v57  ;;  %v1538_v13 = vrot.slane %v1537_v8, 4 }
  0xa7   : > { %v1787_v9 = vsel %vm911_vm7, %v1694_v0, %v1786_v1  ;;  %v1519_v12 = vrot.slane %v1518_v4, 2  ;;  %v1532_v16 = vadd.f32 %v1531_v7, %v1530_v63  ;;  %v1544_v17 = vsel %vm1333_vm9, %v1294_v2, 0.0 }
  0xa8   : > { %1817 = vxpose.xlu1.b32.cont [3/6] (short) (narrow) %v1787_v9, 8  ;;  %v1508_v14 = vadd.f32 %v1507_v5, %v1506_v61  ;;  %v1526_v15 = vrot.slane %v1525_v6, 2  ;;  %v1514_v18 = vrot.slane %v1513_v11, 1  ;;  %v1539_v20 = vadd.f32 %v1538_v13, %v1537_v8  ;;  %v1299_v61 = vld [vmem:[%s2879_s26 + $0x8c] sm:$0x7] }
  0xa9   : > { %v1520_v19 = vadd.f32 %v1519_v12, %v1518_v4  ;;  %v1545_v21 = vrot.slane %v1544_v17, 4  ;;  %v1533_v24 = vrot.slane %v1532_v16, 2  ;;  %v1551_v25 = vsel %vm1333_vm9, %v1295_v10, 0.0  ;;  %v1300_v5 = vld [vmem:[%s2879_s26 + $0x90] sm:$0x7] }
  0xaa   : > { %v1527_v23 = vadd.f32 %v1526_v15, %v1525_v6  ;;  %v1695_v26 = vmul.f32 0.33333334, %v1508_v14  ;;  %v1515_v27 = vadd.f32 %v1514_v18, %v1513_v11  ;;  %v1540_v29 = vrot.slane %v1539_v20, 2  ;;  %v1301_v6 = vld [vmem:[%s2879_s26 + $0x94] sm:$0x7] }
  0xab   : > { %v1521_v28 = vrot.slane %v1520_v19, 1  ;;  %v1546_v30 = vadd.f32 %v1545_v21, %v1544_v17  ;;  %v1534_v32 = vadd.f32 %v1533_v24, %v1532_v16  ;;  %v1552_v33 = vrot.slane %v1551_v25, 4  ;;  %v1302_v14 = vld [vmem:[%s2879_s26 + $0x98] sm:$0x7] }
  0xac   : > { %v1528_v31 = vrot.slane %v1527_v23, 1  ;;  %v1558_v34 = vsel %vm1333_vm9, %v1296_v22, 0.0  ;;  %v1541_v36 = vadd.f32 %v1540_v29, %v1539_v20  ;;  %v1696_v38 = vmul.f32 0.33333334, %v1515_v27 }
  0xad   : > { %v1522_v35 = vadd.f32 %v1521_v28, %v1520_v19  ;;  %v1547_v37 = vrot.slane %v1546_v30, 2  ;;  %v1535_v40 = vrot.slane %v1534_v32, 1  ;;  %v1553_v41 = vadd.f32 %v1552_v33, %v1551_v25 }
  0xae   : > { %v1529_v39 = vadd.f32 %v1528_v31, %v1527_v23  ;;  %v1559_v43 = vrot.slane %v1558_v34, 4  ;;  %v1542_v44 = vrot.slane %v1541_v36, 1  ;;  %v1788_v47 = vsel %vm899_vm1, %v1696_v38, %v1695_v26  ;;  %v1303_v23 = vld [vmem:[%s2879_s26 + $0x9c] sm:$0x7] }
  0xaf   : > { %v1548_v45 = vadd.f32 %v1547_v37, %v1546_v30  ;;  %v1697_v46 = vmul.f32 0.33333334, %v1522_v35  ;;  %v1536_v48 = vadd.f32 %v1535_v40, %v1534_v32  ;;  %v1554_v49 = vrot.slane %v1553_v41, 2 }
  0xb0   : > { %v1698_v50 = vmul.f32 0.33333334, %v1529_v39  ;;  %v1560_v53 = vadd.f32 %v1559_v43, %v1558_v34  ;;  %v1543_v54 = vadd.f32 %v1542_v44, %v1541_v36  ;;  %v1565_v57 = vsel %vm1333_vm9, %v1297_v42, 0.0  ;;  %v1304_v43 = vld [vmem:[%s2879_s26 + $0xa0] sm:$0x7] }
  0xb1   : > { %v1549_v55 = vrot.slane %v1548_v45, 1  ;;  %v1789_v56 = vsel %vm901_vm2, %v1697_v46, %v1788_v47  ;;  %v1555_v58 = vadd.f32 %v1554_v49, %v1553_v41  ;;  %v1699_v59 = vmul.f32 0.33333334, %v1536_v48 }
  0xb2   : > { %v1790_v60 = vsel %vm903_vm3, %v1698_v50, %v1789_v56  ;;  %v1561_v62 = vrot.slane %v1560_v53, 2  ;;  %v1700_v0 = vmul.f32 0.33333334, %v1543_v54  ;;  %v1566_v1 = vrot.slane %v1565_v57, 4 }
  0xb3   : > { %v1550_v63 = vadd.f32 %v1549_v55, %v1548_v45  ;;  %v1572_v2 = vsel %vm1333_vm9, %v1298_v51, 0.0  ;;  %v1556_v3 = vrot.slane %v1555_v58, 1  ;;  %v1791_v4 = vsel %vm905_vm4, %v1699_v59, %v1790_v60 }
  0xb4   : > { %v1562_v7 = vadd.f32 %v1561_v62, %v1560_v53  ;;  %v1573_v8 = vrot.slane %v1572_v2, 4  ;;  %v1792_v10 = vsel %vm907_vm5, %v1700_v0, %v1791_v4  ;;  %v1567_v11 = vadd.f32 %v1566_v1, %v1565_v57 }
  0xb5   : > { %v1701_v9 = vmul.f32 0.33333334, %v1550_v63  ;;  %v1579_v12 = vsel %vm1333_vm9, %v1299_v61, 0.0  ;;  %v1557_v13 = vadd.f32 %v1556_v3, %v1555_v58  ;;  %v1586_v20 = vsel %vm1333_vm9, %v1300_v5, 0.0  ;;  %v1305_v61 = vld [vmem:[%s2879_s26 + $0xa4] sm:$0x7] }
  0xb6   : > { %v1563_v15 = vrot.slane %v1562_v7, 1  ;;  %v1574_v16 = vadd.f32 %v1573_v8, %v1572_v2  ;;  %v1580_v17 = vrot.slane %v1579_v12, 4  ;;  %v1568_v19 = vrot.slane %v1567_v11, 2 }
  0xb7   : > { %v1793_v18 = vsel %vm909_vm6, %v1701_v9, %v1792_v10  ;;  %v1593_v21 = vsel %vm1333_vm9, %v1301_v6, 0.0  ;;  %v1702_v22 = vmul.f32 0.33333334, %v1557_v13  ;;  %v1587_v28 = vrot.slane %v1586_v20, 4  ;;  %v1306_v6 = vld [vmem:[%s2879_s26 + $0xa8] sm:$0x7] }
  0xb8   : > { %v1564_v24 = vadd.f32 %v1563_v15, %v1562_v7  ;;  %v1575_v25 = vrot.slane %v1574_v16, 2  ;;  %v1581_v26 = vadd.f32 %v1580_v17, %v1579_v12  ;;  %v1569_v27 = vadd.f32 %v1568_v19, %v1567_v11  ;;  %v1308_v15 = vld [vmem:[%s2879_s26 + $0xb0] sm:$0x7] }
  0xb9   : > { %v1594_v29 = vrot.slane %v1593_v21, 4  ;;  %v1600_v30 = vsel %vm1333_vm9, %v1302_v14, 0.0  ;;  %v1794_v31 = vsel %vm911_vm7, %v1702_v22, %v1793_v18  ;;  %v1588_v36 = vadd.f32 %v1587_v28, %v1586_v20  ;;  %v1307_v14 = vld [vmem:[%s2879_s26 + $0xac] sm:$0x7] }
  0xba   : > { %v1576_v32 = vadd.f32 %v1575_v25, %v1574_v16  ;;  %v1582_v33 = vrot.slane %v1581_v26, 2  ;;  %v1601_v34 = vrot.slane %v1600_v30, 4  ;;  %1818 = vxpose.xlu1.b32.cont [4/6] (short) (narrow) %v1794_v31, 8  ;;  %v1570_v35 = vrot.slane %v1569_v27, 1 }
  0xbb   : > { %v1595_v37 = vadd.f32 %v1594_v29, %v1593_v21  ;;  %v1607_v38 = vsel %vm1333_vm9, %v1303_v23, 0.0  ;;  %v1589_v45 = vrot.slane %v1588_v36, 2  ;;  %v1703_v47 = vmul.f32 0.33333334, %v1564_v24 }
  0xbc   : > { %v1577_v39 = vrot.slane %v1576_v32, 1  ;;  %v1583_v40 = vadd.f32 %v1582_v33, %v1581_v26  ;;  %v1602_v41 = vadd.f32 %v1601_v34, %v1600_v30  ;;  %v1608_v42 = vrot.slane %v1607_v38, 4  ;;  %v1309_v26 = vld [vmem:[%s2879_s26 + $0xb4] sm:$0x7] }
  0xbd   : > { %v1571_v44 = vadd.f32 %v1570_v35, %v1569_v27  ;;  %v1596_v46 = vrot.slane %v1595_v37, 2  ;;  %v1590_v53 = vadd.f32 %v1589_v45, %v1588_v36  ;;  %v1614_v56 = vsel %vm1333_vm9, %v1304_v43, 0.0  ;;  %v1311_v36 = vld [vmem:[%s2879_s26 + $0xbc] sm:$0x7] }
  0xbe   : > { %v1578_v48 = vadd.f32 %v1577_v39, %v1576_v32  ;;  %v1584_v49 = vrot.slane %v1583_v40, 1  ;;  %v1603_v50 = vrot.slane %v1602_v41, 2  ;;  %v1609_v51 = vadd.f32 %v1608_v42, %v1607_v38  ;;  %v1310_v32 = vld [vmem:[%s2879_s26 + $0xb8] sm:$0x7]  ;;  %s2211_s26 = sshll.u32 %s545_s20, 4  ;;  %s3143_s26 = int_to_ptr.vmem [resolvable:$true] %s2211_s26 }
  0xbf   : > { %v1597_v54 = vadd.f32 %v1596_v46, %v1595_v37  ;;  %v1704_v55 = vmul.f32 0.33333334, %v1571_v44  ;;  %v1591_v62 = vrot.slane %v1590_v53, 1  ;;  %v1615_v1 = vrot.slane %v1614_v56, 4 }
  0xc0   : > { %v1585_v57 = vadd.f32 %v1584_v49, %v1583_v40  ;;  %v1604_v58 = vadd.f32 %v1603_v50, %v1602_v41  ;;  %v1610_v59 = vrot.slane %v1609_v51, 2  ;;  %v1705_v60 = vmul.f32 0.33333334, %v1578_v48 }
  0xc1   : > { %v1598_v63 = vrot.slane %v1597_v54, 1  ;;  %v1795_v0 = vsel %vm899_vm1, %v1704_v55, %v1703_v47  ;;  %v1592_v7 = vadd.f32 %v1591_v62, %v1590_v53  ;;  %v1616_v9 = vadd.f32 %v1615_v1, %v1614_v56 }
  0xc2   : > { %v1605_v2 = vrot.slane %v1604_v58, 1  ;;  %v1611_v3 = vadd.f32 %v1610_v59, %v1609_v51  ;;  %v1706_v4 = vmul.f32 0.33333334, %v1585_v57  ;;  %v1796_v5 = vsel %vm901_vm2, %v1705_v60, %v1795_v0 }
  0xc3   : > { %v1599_v8 = vadd.f32 %v1598_v63, %v1597_v54  ;;  %v1621_v10 = vsel %vm1333_vm9, %v1305_v61, 0.0  ;;  %v1707_v17 = vmul.f32 0.33333334, %v1592_v7  ;;  %v1617_v19 = vrot.slane %v1616_v9, 2 }
  0xc4   : > { %v1606_v11 = vadd.f32 %v1605_v2, %v1604_v58  ;;  %v1612_v12 = vrot.slane %v1611_v3, 1  ;;  %v1797_v13 = vsel %vm903_vm3, %v1706_v4, %v1796_v5  ;;  %v1622_v16 = vrot.slane %v1621_v10, 4 }
  0xc5   : > { %v1708_v18 = vmul.f32 0.33333334, %v1599_v8  ;;  %v1628_v20 = vsel %vm1333_vm9, %v1306_v6, 0.0  ;;  %v1798_v25 = vsel %vm905_vm4, %v1707_v17, %v1797_v13  ;;  %v1618_v27 = vadd.f32 %v1617_v19, %v1616_v9  ;;  %v2499_v17 = vld [vmem:[%s3244_s4 + $0x8] sm:$0xff]  }
  0xc6   : > { %v1613_v21 = vadd.f32 %v1612_v12, %v1611_v3  ;;  %v1709_v22 = vmul.f32 0.33333334, %v1606_v11  ;;  %v1623_v23 = vadd.f32 %v1622_v16, %v1621_v10  ;;  %v1629_v24 = vrot.slane %v1628_v20, 4  ;;  %2405 = vmatpush3.bf16.msra.mxu1 %v2499_v17 }
  0xc7   : > { %v1635_v28 = vsel %vm1333_vm9, %v1307_v14, 0.0  ;;  %v1642_v29 = vsel %vm1333_vm9, %v1308_v15, 0.0  ;;  %v1799_v31 = vsel %vm907_vm5, %v1708_v18, %v1798_v25  ;;  %v1619_v37 = vrot.slane %v1618_v27, 1  ;;  %2406 = vmatprep.subr.bf16.mxu1 %v2624_v52 }
  0xc8   : > { %v1710_v30 = vmul.f32 0.33333334, %v1613_v21  ;;  %v1624_v33 = vrot.slane %v1623_v23, 2  ;;  %v1630_v34 = vadd.f32 %v1629_v24, %v1628_v20  ;;  %v1800_v35 = vsel %vm909_vm6, %v1709_v22, %v1799_v31 }
  0xc9   : > { %v1636_v38 = vrot.slane %v1635_v28, 4  ;;  %v1643_v39 = vrot.slane %v1642_v29, 4  ;;  %v1649_v43 = vsel %vm1333_vm9, %v1309_v26, 0.0  ;;  %v1620_v44 = vadd.f32 %v1619_v37, %v1618_v27 }
  0xca   : > { %v1801_v40 = vsel %vm911_vm7, %v1710_v30, %v1800_v35  ;;  %v1625_v41 = vadd.f32 %v1624_v33, %v1623_v23  ;;  %v1631_v42 = vrot.slane %v1630_v34, 2  ;;  %v1650_v47 = vrot.slane %v1649_v43, 4 }
  0xcb   : > { %1819 = vxpose.xlu1.b32.cont [5/6] (short) (narrow) %v1801_v40, 8  ;;  %v1637_v45 = vadd.f32 %v1636_v38, %v1635_v28  ;;  %v1644_v46 = vadd.f32 %v1643_v39, %v1642_v29  ;;  %v1656_v50 = vsel %vm1333_vm9, %v1310_v32, 0.0  ;;  %v1663_v51 = vsel %vm1333_vm9, %v1311_v36, 0.0 }
  0xcc   : > { %v1626_v48 = vrot.slane %v1625_v41, 1  ;;  %v1632_v49 = vadd.f32 %v1631_v42, %v1630_v34  ;;  %v1651_v55 = vadd.f32 %v1650_v47, %v1649_v43  ;;  %v1657_v56 = vrot.slane %v1656_v50, 4 }
  0xcd   : > { %v1638_v53 = vrot.slane %v1637_v45, 2  ;;  %v1645_v54 = vrot.slane %v1644_v46, 2  ;;  %v1664_v59 = vrot.slane %v1663_v51, 4  ;;  %v1711_v60 = vmul.f32 0.33333334, %v1620_v44 }
  0xce   : > { %v1627_v57 = vadd.f32 %v1626_v48, %v1625_v41  ;;  %v1633_v58 = vrot.slane %v1632_v49, 1  ;;  %v1652_v63 = vrot.slane %v1651_v55, 2  ;;  %v1658_v0 = vadd.f32 %v1657_v56, %v1656_v50 }
  0xcf   : > { %v1639_v61 = vadd.f32 %v1638_v53, %v1637_v45  ;;  %v1646_v62 = vadd.f32 %v1645_v54, %v1644_v46  ;;  %v1665_v2 = vadd.f32 %v1664_v59, %v1663_v51  ;;  %v2500_v59 = vld [vmem:[%s3245_s6 + $0x8] sm:$0xff]   ;;  %vm2158_vm0 = vcmask 122880  }
  0xd0   : > { %v1634_v1 = vadd.f32 %v1633_v58, %v1632_v49  ;;  %v1712_v3 = vmul.f32 0.33333334, %v1627_v57  ;;  %v1653_v6 = vadd.f32 %v1652_v63, %v1651_v55  ;;  %v1659_v7 = vrot.slane %v1658_v0, 2 }
  0xd1   : > { %v1640_v4 = vrot.slane %v1639_v61, 1  ;;  %v1647_v5 = vrot.slane %v1646_v62, 1  ;;  %v1666_v8 = vrot.slane %v1665_v2, 2 }
  0xd2   : > { %v1713_v9 = vmul.f32 0.33333334, %v1634_v1  ;;  %v1802_v10 = vsel %vm899_vm1, %v1712_v3, %v1711_v60  ;;  %v1654_v13 = vrot.slane %v1653_v6, 1  ;;  %v1660_v14 = vadd.f32 %v1659_v7, %v1658_v0  ;;  %v2501_v60 = vld [vmem:[%s3244_s4] sm:$0xff]   ;;  %s2532_s4 = scalar_lea.vmem %s3143_s26, 16 }
  0xd3   : > { %v1641_v11 = vadd.f32 %v1640_v4, %v1639_v61  ;;  %v1648_v12 = vadd.f32 %v1647_v5, %v1646_v62  ;;  %v1667_v15 = vadd.f32 %v1666_v8, %v1665_v2  ;;  %v2502_v61 = vld [vmem:[%s3245_s6] sm:$0xff]   ;;  %2407 = vmatpush3.bf16.msra.mxu1 %v2501_v60  ;;  %p2533_p11 = scmp.ne.s32.totalorder %s3143_s26, %s2532_s4 }
  0xd4   : > { %v1803_v16 = vsel %vm901_vm2, %v1713_v9, %v1802_v10  ;;  %v1655_v18 = vadd.f32 %v1654_v13, %v1653_v6  ;;  %v1661_v19 = vrot.slane %v1660_v14, 1  ;;  %2420 = vmatprep.subr.bf16.mxu1 %v2624_v52 }
  0xd5   : > { %v1714_v20 = vmul.f32 0.33333334, %v1641_v11  ;;  %v1715_v21 = vmul.f32 0.33333334, %v1648_v12  ;;  %v1668_v22 = vrot.slane %v1667_v15, 1  ;;  %p2534_p12 = pnand %p2533_p11, %p2751_p5 }
  0xd6   : > { %v1662_v23 = vadd.f32 %v1661_v19, %v1660_v14  ;;  %v1716_v24 = vmul.f32 0.33333334, %v1655_v18  ;;  %v2340_v11 = vld [vmem:[%s3246_s3] ss:$0 sm:$0xff]  ;;  %s3229_s3 = sshll.u32 %s2734_s25, 4 }
  0xd7   : > { %v1804_v25 = vsel %vm903_vm3, %v1714_v20, %v1803_v16  ;;  %v1669_v27 = vadd.f32 %v1668_v22, %v1667_v15  ;;  %v2503_v22 = vld [vmem:[%s3247_s8 + $0x10] sm:$0xff]   ;;  %s3141_s1 = scalar_lea.hbm %s3228_s16, %s3229_s3  ;;  %p2535_p13 = pneg %p2534_p12 }
  0xd8   : > { %v1805_v28 = vsel %vm905_vm4, %v1715_v21, %v1804_v25  ;;  %v1717_v30 = vmul.f32 0.33333334, %v1662_v23 }
  0xd9   : > { %v1718_v31 = vmul.f32 0.33333334, %v1669_v27  ;;  %v1806_v32 = vsel %vm907_vm5, %v1716_v24, %v1805_v28  ;;  %v2504_v28 = vld [vmem:[%s3247_s8 + $0x8] sm:$0xff]  }
  0xda   : > { %v1807_v44 = vsel %vm909_vm6, %v1717_v30, %v1806_v32 }
  0xdb   : > { %v1808_v48 = vsel %vm911_vm7, %v1718_v31, %v1807_v44  ;;  %v2505_v31 = vld [vmem:[%s3247_s8] sm:$0xff]  }
  0xdc   : > { %1820 = vxpose.xlu1.b32.end [6/6] (short) (narrow) %v1808_v48, 8 }
  0xe2   : > { %v954_v26 = vpop.trf.xlu0 }
  0xe3   : > { %v971_v29 = vrot.slane %v954_v26, 7 }
  0xe5   : > { %v974_v33 = vsel %vm973_vm10, -inf, %v971_v29  ;;  %v975_v34 = vsel %vm973_vm10, %v971_v29, -inf  ;;  %v976_v35 = vsel %vm973_vm10, 0.0, %v971_v29  ;;  %v977_v36 = vsel %vm973_vm10, %v971_v29, 0.0 }
  0xe6   : > { %v981_v37 = vrot.slane %v974_v33, 1  ;;  %v982_v38 = vrot.slane %v975_v34, 1  ;;  %v994_v39 = vrot.slane %v976_v35, 1  ;;  %v995_v40 = vrot.slane %v977_v36, 1 }
  0xe7   : > { %v999_v41 = vrot.slane %v976_v35, 2  ;;  %v1000_v42 = vrot.slane %v977_v36, 2  ;;  %v987_v45 = vrot.slane %v974_v33, 2  ;;  %v988_v46 = vrot.slane %v975_v34, 2  ;;  %v2506_v34 = vld [vmem:[%s3222_s10 + $0x10] sm:$0xff]   ;;  %v2508_v36 = vld [vmem:[%s3222_s10 + $0x8] sm:$0xff]  }
  0xe8   : > { %v983_v43 = vsel %vm980_vm11, %v981_v37, %v982_v38  ;;  %v996_v47 = vsel %vm980_vm11, %v994_v39, %v995_v40  ;;  %v2509_v37 = vld [vmem:[%s3224_s12 + $0x8] sm:$0xff]   ;;  %v2510_v38 = vld [vmem:[%s3222_s10] sm:$0xff]  }
  0xe9   : > { %v985_v49 = vmax.f32 %v974_v33, %v983_v43  ;;  %v998_v50 = vadd.f32 %v996_v47, %v976_v35  ;;  %v1001_v51 = vsel %vm986_vm12, %v999_v41, %v1000_v42  ;;  %v989_v54 = vsel %vm986_vm12, %v987_v45, %v988_v46  ;;  %v2507_v35 = vld [vmem:[%s3224_s12 + $0x10] sm:$0xff]   ;;  %v2511_v39 = vld [vmem:[%s3224_s12] sm:$0xff]  }
  0xea   : > { %v2344_v40 = vld [vmem:[%s3248_s5] ss:$0 sm:$0xff]  ;;  %s2626_s5 = smov [#allocation4]  }
  0xeb   : > { %v1003_v53 = vadd.f32 %v1001_v51, %v998_v50  ;;  %v991_v55 = vmax.f32 %v985_v49, %v989_v54  ;;  %v2348_v41 = vld [vmem:[%s3249_s7] ss:$0 sm:$0xff]  ;;  %s2536_s6 = sshll.u32 %s2626_s5, 4  ;;  %s2537_s6 = int_to_ptr.vmem [resolvable:$false] %s2536_s6 }
  0xec   : > { %s2538_s28 = scalar_lea.vmem %s2537_s6, 32  ;;  %p2539_p0 = scmp.lt.s32.totalorder %s3143_s26, %s2537_s6 }
  0xed   : > { %v1004_v56 = vmul.f32 0.33333334, %v1003_v53  ;;  %v2353_v53 = vld [vmem:[%s3221_s9] ss:$0 sm:$0xff]  ;;  %p2540_p1 = scmp.lt.s32.totalorder %s2538_s28, %s2532_s4 }
  0xef   : > { %v1005_v57 = vadd.f32 %v1004_v56, %v991_v55  ;;  %p2541_p2 = por %p2540_p1, %p2539_p0 }
  0xf1   : > { %v1006_v58 = vpack.c.bf16 %v1005_v57, %v1005_v57  ;;  %p2542_p3 = pnand %p2541_p2, %p2535_p13 }
  0xf3   : > { %2401 = vmatmul.mubr.msk.bf16.vlgmr.msra.gmra.mxu0 %vm1025_vm13, %v1006_v58 }
  0xf4   : > { %2416 = vmatprep.mubr.msk.bf16.mxu0 %vm2625_vm8, %v2624_v52  ;;  %2413 = vmatpush3.bf16.msra.mxu0 %v2500_v59 }
  0xf5   : > { %2414 = vmatprep.subr.bf16.mxu0 %v2624_v52 }
  0xf8   : > { %2415 = vmatpush3.bf16.msra.mxu0 %v2502_v61 }
  0xf9   : > { %2430 = vmatprep.subr.bf16.mxu0 %v2624_v52 }
 0x144   : > { %v1831_v62 = vpop.trf.xlu1 }
 0x145   : > { %v1848_v63 = vrot.slane %v1831_v62, 7 }
 0x147   : > { %v1852_v0 = vsel %vm973_vm10, 0.0, %v1848_v63  ;;  %v1853_v1 = vsel %vm973_vm10, %v1848_v63, 0.0  ;;  %v1850_v2 = vsel %vm973_vm10, -inf, %v1848_v63  ;;  %v1851_v5 = vsel %vm973_vm10, %v1848_v63, -inf }
 0x148   : > { %v1868_v3 = vrot.slane %v1852_v0, 1  ;;  %v1869_v4 = vrot.slane %v1853_v1, 1  ;;  %v1856_v6 = vrot.slane %v1850_v2, 1  ;;  %v1857_v7 = vrot.slane %v1851_v5, 1 }
 0x149   : > { %v1873_v9 = vrot.slane %v1852_v0, 2  ;;  %v1874_v10 = vrot.slane %v1853_v1, 2  ;;  %v1861_v16 = vrot.slane %v1850_v2, 2  ;;  %v1862_v17 = vrot.slane %v1851_v5, 2 }
 0x14a   : > { %v1870_v8 = vsel %vm980_vm11, %v1868_v3, %v1869_v4  ;;  %v1858_v15 = vsel %vm980_vm11, %v1856_v6, %v1857_v7 }
 0x14b   : > { %v1872_v13 = vadd.f32 %v1870_v8, %v1852_v0  ;;  %v1875_v18 = vsel %vm986_vm12, %v1873_v9, %v1874_v10  ;;  %v1860_v23 = vmax.f32 %v1850_v2, %v1858_v15  ;;  %v1863_v26 = vsel %vm986_vm12, %v1861_v16, %v1862_v17 }
 0x14d   : > { %v1877_v24 = vadd.f32 %v1875_v18, %v1872_v13  ;;  %v1865_v29 = vmax.f32 %v1860_v23, %v1863_v26 }
 0x14f   : > { %v1878_v30 = vmul.f32 0.33333334, %v1877_v24 }
 0x151   : > { %v1879_v32 = vadd.f32 %v1878_v30, %v1865_v29 }
 0x153   : > { %v1880_v33 = vpack.c.bf16 %v1879_v32, %v1879_v32 }
 0x1b3   : > { %v1063_v12 = vpop.f32.mrf.mxu0 }
 0x1b4   : > { %v1064_v14 = vadd.f32 %v2340_v11, %v1063_v12 }
 0x1b5   : > { %v2402_v19 = vpop.f32.mrf.mxu0 }
 0x1b6   : > { %v1069_v20 = vmax.f32 %v1064_v14, 0.0 }
 0x1b7   : > { %v1066_v21 = vpop.f32.mrf.mxu0 }
 0x1b8   : > { %v1070_v25 = vpack.c.bf16 %v1069_v20, %v1069_v20  ;;  %v2358_v21 = vld [vmem:[%s3223_s11] ss:$0 sm:$0xff] }
 0x1b9   : > { %v2403_v27 = vpop.f32.mrf.mxu0 }
 0x1ba   : > { %2409 = vmatmul.mubr.msk.bf16.vlgmr.msra.gmra.mxu1 %vm1025_vm13, %v1070_v25  ;;  %2417 = vmatmul.mubr.msk.bf16.vlgmr.msra.gmra.mxu0 %vm1025_vm13, %v1070_v25 }
 0x1bb   : > { %2421 = vmatpush3.bf16.msra.mxu1 %v2503_v22  ;;  %2426 = vmatprep.mubr.msk.bf16.mxu1 %vm2625_vm8, %v2624_v52  ;;  %v2363_v22 = vld [vmem:[%s3225_s13] ss:$0 sm:$0xff] }
 0x1bc   : > { %2422 = vmatprep.subr.bf16.mxu1 %v2624_v52  ;;  %2436 = vmatprep.mubr.msk.bf16.mxu0 %vm2625_vm8, %v2624_v52 }
 0x1bd   : > { %2431 = vmatpush3.bf16.msra.mxu0 %v2506_v34 }
 0x1be   : > { %2432 = vmatprep.subr.bf16.mxu0 %v2624_v52 }
 0x1bf   : > { %2423 = vmatpush3.bf16.msra.mxu1 %v2504_v28 }
 0x1c0   : > { %2424 = vmatprep.subr.bf16.mxu1 %v2624_v52 }
 0x1c1   : > { %2433 = vmatpush3.bf16.msra.mxu0 %v2508_v36 }
 0x1c2   : > { %2434 = vmatprep.subr.bf16.mxu0 %v2624_v52 }
 0x1c3   : > { %2425 = vmatpush3.bf16.msra.mxu1 %v2505_v31 }
 0x1c4   : > { %2440 = vmatprep.subr.bf16.mxu1 %v2624_v52 }
 0x1c5   : > { %2435 = vmatpush3.bf16.msra.mxu0 %v2510_v38 }
 0x1c6   : > { %2427 = vmatmul.mubr.msk.bf16.vlgmr.msra.gmra.mxu1 %vm1905_vm14, %v1880_v33 }
 0x1c7   : > { %2446 = vmatprep.mubr.msk.bf16.mxu1 %vm2625_vm8, %v2624_v52  ;;  %2441 = vmatpush3.bf16.msra.mxu1 %v2507_v35 }
 0x1c8   : > { %2442 = vmatprep.subr.bf16.mxu1 %v2624_v52 }
 0x1cb   : > { %2443 = vmatpush3.bf16.msra.mxu1 %v2509_v37 }
 0x1cc   : > { %2444 = vmatprep.subr.bf16.mxu1 %v2624_v52 }
 0x1cf   : > { %2445 = vmatpush3.bf16.msra.mxu1 %v2511_v39 }
 0x27a   : > { %v1126_v42 = vpop.f32.mrf.mxu1  ;;  %v1205_v52 = vpop.f32.mrf.mxu0 }
 0x27b   : > { %v1127_v43 = vadd.f32 %v2344_v40, %v1126_v42  ;;  %v1206_v44 = vadd.f32 %v2348_v41, %v1205_v52 }
 0x27c   : > { %v2410_v45 = vpop.f32.mrf.mxu1  ;;  %v2418_v46 = vpop.f32.mrf.mxu0 }
 0x27d   : > { %2512 = vtanh.f32 %v1127_v43  ;;  %v2352_v47 = vmul.f32 -1.442695, %v1206_v44 }
 0x27e   : > { %v1129_v48 = vpop.f32.mrf.mxu1  ;;  %v1208_v49 = vpop.f32.mrf.mxu0 }
 0x27f   : > { %2514 = vpow2.f32 %v2352_v47 }
 0x280   : > { %v2411_v50 = vpop.f32.mrf.mxu1  ;;  %v2419_v51 = vpop.f32.mrf.mxu0 }
 0x286   : > { %v1943_v54 = vpop.f32.mrf.mxu1 }
 0x287   : > { %v1944_v55 = vadd.f32 %v2353_v53, %v1943_v54 }
 0x288   : > { %v2428_v56 = vpop.f32.mrf.mxu1 }
 0x289   : > { %v1949_v57 = vmax.f32 %v1944_v55, 0.0 }
 0x28a   : > { %v2513_v58 = vpop.eup %2512  ;;  %v1946_v59 = vpop.f32.mrf.mxu1 }
 0x28b   : > { %v1134_v60 = vsel %vm1133_vm15, %v2513_v58, -inf  ;;  %v1950_v61 = vpack.c.bf16 %v1949_v57, %v1949_v57 }
 0x28c   : > { %v2515_v62 = vpop.eup %2514  ;;  %v1135_v63 = vrot.slane %v1134_v60, 4  ;;  %v2429_v0 = vpop.f32.mrf.mxu1 }
 0x28d   : > { %v1214_v1 = vadd.f32 1.0, %v2515_v62  ;;  %2437 = vmatmul.mubr.msk.bf16.vlgmr.msra.gmra.mxu0 %vm1905_vm14, %v1950_v61  ;;  %2447 = vmatmul.mubr.msk.bf16.vlgmr.msra.gmra.mxu1 %vm1905_vm14, %v1950_v61 }
 0x28e   : > { %v1136_v2 = vmax.f32 %v1134_v60, %v1135_v63 }
 0x28f   : > { %2516 = vrcp.f32 %v1214_v1 }
 0x290   : > { %v1137_v3 = vrot.slane %v1136_v2, 2 }
 0x292   : > { %v1138_v4 = vmax.f32 %v1136_v2, %v1137_v3 }
 0x294   : > { %v1139_v5 = vrot.slane %v1138_v4, 1 }
 0x296   : > { %v1140_v6 = vmax.f32 %v1138_v4, %v1139_v5 }
 0x298   : > { %v1141_v7 = vsub.f32 %v2513_v58, %v1140_v6 }
 0x29a   : > { %v1142_v8 = vmul.f32 1.442695, %v1141_v7 }
 0x29c   : > { %v2517_v9 = vpop.eup %2516  ;;  %2518 = vpow2.f32 %v1142_v8 }
 0x29d   : > { %1232 = vxpose.xlu0.b32.start.end [1/1] (short) (narrow) %v2517_v9, 16  ;;  %v1225_v40 = vsel %vm1133_vm15, %v2517_v9, -inf }
 0x29e   : > { %v1226_v52 = vrot.slane %v1225_v40, 4 }
 0x2a0   : > { %v1227_v45 = vmax.f32 %v1225_v40, %v1226_v52 }
 0x2a2   : > { %v1228_v48 = vrot.slane %v1227_v45, 2 }
 0x2a4   : > { %v1229_v51 = vmax.f32 %v1227_v45, %v1228_v48 }
 0x2a6   : > { %v1230_v55 = vrot.slane %v1229_v51, 1 }
 0x2a8   : > { %v1231_v58 = vmax.f32 %v1229_v51, %v1230_v55 }
 0x2a9   : > { %v2519_v10 = vpop.eup %2518 }
 0x2aa   : > { %v1144_v11 = vsel %vm1133_vm15, %v2519_v10, 0.0  ;;  %v2169_v63 = vmul.f32 0.7, %v1231_v58 }
 0x2ab   : > { %v1145_v12 = vrot.slane %v1144_v11, 4 }
 0x2ad   : > { %v1146_v13 = vadd.f32 %v1145_v12, %v1144_v11 }
 0x2af   : > { %v1147_v14 = vrot.slane %v1146_v13, 2 }
 0x2b1   : > { %v1148_v15 = vadd.f32 %v1147_v14, %v1146_v13 }
 0x2b3   : > { %v1149_v16 = vrot.slane %v1148_v15, 1 }
 0x2b5   : > { %v1150_v17 = vadd.f32 %v1149_v16, %v1148_v15 }
 0x2b7   : > { %2520 = vrcp.f32 %v1150_v17 }
 0x2c4   : > { %v2521_v18 = vpop.eup %2520 }
 0x2c5   : > { %v1152_v19 = vmul.f32 %v2521_v18, %v2519_v10 }
 0x2c7   : > { %v3115_v20 = vmul.f32 %v2517_v9, %v1152_v19 }
 0x34d   : > { %v2012_v23 = vpop.f32.mrf.mxu0  ;;  %v2096_v24 = vpop.f32.mrf.mxu1 }
 0x34e   : > { %v2013_v25 = vadd.f32 %v2358_v21, %v2012_v23  ;;  %v2097_v26 = vadd.f32 %v2363_v22, %v2096_v24 }
 0x34f   : > { %v2438_v27 = vpop.f32.mrf.mxu0  ;;  %v2448_v28 = vpop.f32.mrf.mxu1 }
 0x350   : > { %2522 = vtanh.f32 %v2013_v25  ;;  %v2368_v29 = vmul.f32 -1.442695, %v2097_v26 }
 0x351   : > { %v2015_v30 = vpop.f32.mrf.mxu0  ;;  %v2099_v31 = vpop.f32.mrf.mxu1 }
 0x352   : > { %2524 = vpow2.f32 %v2368_v29 }
 0x353   : > { %v2439_v32 = vpop.f32.mrf.mxu0  ;;  %v2449_v33 = vpop.f32.mrf.mxu1 }
 0x35d   : > { %v2523_v34 = vpop.eup %2522 }
 0x35e   : > { %v2019_v35 = vsel %vm1133_vm15, %v2523_v34, -inf }
 0x35f   : > { %v2525_v36 = vpop.eup %2524  ;;  %v2020_v37 = vrot.slane %v2019_v35, 4 }
 0x360   : > { %v2105_v38 = vadd.f32 1.0, %v2525_v36 }
 0x361   : > { %v2021_v39 = vmax.f32 %v2019_v35, %v2020_v37 }
 0x362   : > { %2526 = vrcp.f32 %v2105_v38 }
 0x363   : > { %v2022_v41 = vrot.slane %v2021_v39, 2 }
 0x365   : > { %v2023_v42 = vmax.f32 %v2021_v39, %v2022_v41 }
 0x367   : > { %v2024_v43 = vrot.slane %v2023_v42, 1 }
 0x369   : > { %v2025_v44 = vmax.f32 %v2023_v42, %v2024_v43 }
 0x36b   : > { %v2026_v46 = vsub.f32 %v2523_v34, %v2025_v44 }
 0x36d   : > { %v2027_v47 = vmul.f32 1.442695, %v2026_v46 }
 0x36f   : > { %v3125_v49 = vpop.eup %2526  ;;  %2528 = vpow2.f32 %v2027_v47 }
 0x370   : > { %2123 = vxpose.xlu0.b32.start.end [1/1] (short) (narrow) %v3125_v49, 16  ;;  %v2116_v50 = vsel %vm1133_vm15, %v3125_v49, -inf }
 0x371   : > { %v2117_v53 = vrot.slane %v2116_v50, 4 }
 0x373   : > { %v2118_v54 = vmax.f32 %v2116_v50, %v2117_v53 }
 0x375   : > { %v2119_v56 = vrot.slane %v2118_v54, 2 }
 0x377   : > { %v2120_v57 = vmax.f32 %v2118_v54, %v2119_v56 }
 0x379   : > { %v2121_v59 = vrot.slane %v2120_v57, 1 }
 0x37b   : > { %v2122_v60 = vmax.f32 %v2120_v57, %v2121_v59 }
 0x37c   : > { %v2529_v61 = vpop.eup %2528 }
 0x37d   : > { %v2029_v62 = vsel %vm1133_vm15, %v2529_v61, 0.0  ;;  %v2170_v0 = vmul.f32 0.3, %v2122_v60 }
 0x37e   : > { %v2030_v1 = vrot.slane %v2029_v62, 4 }
 0x37f   : > { %v2171_v2 = vadd.f32 %v2170_v0, %v2169_v63 }
 0x380   : > { %v2031_v3 = vadd.f32 %v2030_v1, %v2029_v62 }
 0x381   : > { %2172 = vst.msk [vmem:[%s545_s20] sm:$0x1] %vm2158_vm0, %v2171_v2 }
 0x382   : > { %v2032_v4 = vrot.slane %v2031_v3, 2 }
 0x383   : > { %2545 = shalt.err (!%p2542_p3)
}
 0x384   : > { %s2546_s20 = scalar_lea.hbm %s3141_s1, 16  ;;  %s2550_s5 = scalar_lea.hbm %s3228_s16, 32 }
 0x385   : > { %p2547_p4 = scmp.ne.s32.totalorder %s3141_s1, %s2546_s20  ;;  %p2551_p9 = scmp.lt.s32.totalorder %s3141_s1, %s3228_s16 }
 0x386   : > { %p2552_p10 = scmp.lt.s32.totalorder %s2550_s5, %s2546_s20 }
 0x387   : > { %p2548_p7 = pnand %p2547_p4, %p2751_p5 }
 0x388   : > { %p2553_p11 = por %p2552_p10, %p2551_p9 }
 0x389   : > { %p2549_p8 = pneg %p2548_p7 }
 0x38b   : > { %p2554_p12 = pnand %p2553_p11, %p2549_p8 }
 0x38d   : > { %2557 = shalt.err (!%p2554_p12)
}
 0x38e   : > { %2452 = dma.vmem_to_hbm [thread:$0]  (%p2751_p5), %s3143_s26, 16, %s3141_s1, %s2183_s19   ;;  %v2033_v5 = vadd.f32 %v2032_v4, %v2031_v3  ;;  %v1218_v8 = vsel %vm1133_vm15, %v3115_v20, 0.0 }
 0x38f   : > { %v1219_v9 = vrot.slane %v1218_v8, 4  ;;  %s532_s4 = scalar_lea.vmem [#allocation2], %s3131_s2  ;;  %s3250_s7 = sshll.u32 %s2734_s25, 4 }
 0x390   : > { %v2034_v6 = vrot.slane %v2033_v5, 1  ;;  %s2195_s6 = sshll.u32 %s532_s4, 4  ;;  %s2193_s26 = scalar_lea.hbm %s3226_s14, %s3250_s7  ;;  %s2196_s6 = int_to_ptr.vmem [resolvable:$true] %s2195_s6 }
 0x391   : > { %v1220_v10 = vadd.f32 %v1219_v9, %v1218_v8  ;;  %s2174_s1 = scalar_lea.sflag [#allocation3], %s3131_s2  ;;  %s2558_s19 = scalar_lea.vmem %s2196_s6, 16 }
 0x392   : > { %v2035_v7 = vadd.f32 %v2034_v6, %v2033_v5  ;;  %p2559_p13 = scmp.ne.s32.totalorder %s2196_s6, %s2558_s19  ;;  %s2627_s28 = smov [#allocation2]  }
 0x393   : > { %v1221_v13 = vrot.slane %v1220_v10, 2  ;;  %s2562_s20 = sshll.u32 %s2627_s28, 4  ;;  %s2563_s20 = int_to_ptr.vmem [resolvable:$false] %s2562_s20 }
 0x394   : > { %2530 = vrcp.f32 %v2035_v7  ;;  %p2560_p0 = pnand %p2559_p13, %p2751_p5  ;;  %s2564_s29 = scalar_lea.vmem %s2563_s20, 32 }
 0x395   : > { %v1222_v16 = vadd.f32 %v1221_v13, %v1220_v10  ;;  %p2565_p2 = scmp.lt.s32.totalorder %s2196_s6, %s2563_s20  ;;  %p2566_p3 = scmp.lt.s32.totalorder %s2564_s29, %s2558_s19 }
 0x396   : > { %p2561_p1 = pneg %p2560_p0 }
 0x397   : > { %v1223_v19 = vrot.slane %v1222_v16, 1  ;;  %p2567_p4 = por %p2566_p3, %p2565_p2 }
 0x399   : > { %v1224_v20 = vadd.f32 %v1223_v19, %v1222_v16  ;;  %p2568_p7 = pnand %p2567_p4, %p2561_p1 }
 0x39b   : > { %v2155_v25 = vmul.f32 0.7, %v1224_v20 }
 0x3a1   : > { %v2531_v11 = vpop.eup %2530 }
 0x3a2   : > { %v2037_v12 = vmul.f32 %v2531_v11, %v2529_v61 }
 0x3a4   : > { %v2108_v14 = vmul.f32 %v3125_v49, %v2037_v12 }
 0x3a6   : > { %v2109_v15 = vsel %vm1133_vm15, %v2108_v14, 0.0 }
 0x3a7   : > { %v2110_v17 = vrot.slane %v2109_v15, 4 }
 0x3a9   : > { %v2111_v18 = vadd.f32 %v2110_v17, %v2109_v15 }
 0x3ab   : > { %v2112_v21 = vrot.slane %v2111_v18, 2 }
 0x3ad   : > { %v2113_v22 = vadd.f32 %v2112_v21, %v2111_v18 }
 0x3af   : > { %v2114_v23 = vrot.slane %v2113_v22, 1 }
 0x3b1   : > { %v2115_v24 = vadd.f32 %v2114_v23, %v2113_v22 }
 0x3b3   : > { %v2156_v26 = vmul.f32 0.3, %v2115_v24 }
 0x3b5   : > { %v2157_v27 = vadd.f32 %v2156_v26, %v2155_v25 }
 0x3b7   : > { %2159 = vst.msk [vmem:[%s532_s4] sm:$0x1] %vm2158_vm0, %v2157_v27 }
 0x3b8   : > { %2571 = shalt.err (!%p2568_p7)
}
 0x3b9   : > { %s2572_s25 = scalar_lea.hbm %s2193_s26, 16  ;;  %s2576_s4 = scalar_lea.hbm %s3226_s14, 32 }
 0x3ba   : > { %p2573_p8 = scmp.ne.s32.totalorder %s2193_s26, %s2572_s25  ;;  %p2577_p11 = scmp.lt.s32.totalorder %s2193_s26, %s3226_s14 }
 0x3bb   : > { %p2578_p12 = scmp.lt.s32.totalorder %s2576_s4, %s2572_s25 }
 0x3bc   : > { %p2574_p9 = pnand %p2573_p8, %p2751_p5 }
 0x3bd   : > { %p2579_p13 = por %p2578_p12, %p2577_p11 }
 0x3be   : > { %p2575_p10 = pneg %p2574_p9 }
 0x3c0   : > { %p2580_p0 = pnand %p2579_p13, %p2575_p10 }
 0x3c2   : > { %2583 = shalt.err (!%p2580_p0)
}
 0x3c3   : > { %2451 = dma.vmem_to_hbm [thread:$0]  (%p2751_p5), %s2196_s6, 16, %s2193_s26, %s2174_s1   ;;  %v1248_v28 = vpop.trf.xlu0  ;;  %vm2166_vm1 = vcmask 64512  }
 0x3c4   : > { %s2374_s3 = sshll.u32 %s2763_s18, 4  ;;  %v2160_v31 = vmul.f32 0.7, %v1248_v28 }
 0x3c5   : > { %s560_s20 = scalar_lea.vmem %s3227_s15, %s2374_s3 }
 0x3c7   : > { %v1249_v29 = vpop.trf.xlu0 }
 0x3c8   : > { %v2161_v35 = vmul.f32 0.7, %v1249_v29 }
 0x3ec   : > { %v2139_v30 = vpop.trf.xlu0 }
 0x3ed   : > { %v2162_v32 = vmul.f32 0.3, %v2139_v30 }
 0x3ef   : > { %v2164_v33 = vadd.f32 %v2162_v32, %v2160_v31 }
 0x3f0   : > { %v2140_v34 = vpop.trf.xlu0 }
 0x3f1   : > { %2167 = vst.msk [vmem:[%s560_s20] sm:$0xff] %vm2166_vm1, %v2164_v33  ;;  %v2163_v36 = vmul.f32 0.3, %v2140_v34 }
 0x3f3   : > { %v2165_v37 = vadd.f32 %v2163_v36, %v2161_v35 }
 0x3f5   : > { %2168 = vst.msk [vmem:[%s560_s20 + $0x8] sm:$0xff] %vm2166_vm1, %v2165_v37 }
 0x3f6 PF: > { %p2462_p5 = scmp.ge.s32.totalorder %s2622_s24, 2  ;;  %s2223_s0 = sand.u32 1, %s2610_s21  }
 0x3f7   : > { %s2224_s18 = scalar_lea.sflag [#allocation3], %s2223_s0 }
 0x3f8   : > { %p2456_p1 = pnand %p2462_p5, %p2755_p6 }
 0x3fa   : > { %p2457_p2 = pneg %p2456_p1 }
 0x3fc   : > { %2601 = dma.done.wait (%p2457_p2), %s2224_s18, 16  }
 0x3fd   : > { %2603 = vsyncadd (%p2457_p2), %s2224_s18, 4294967280  ;;  %s2240_s6 = scalar_lea.sflag [#allocation5], %s2223_s0 }
 0x3fe   : > { %2605 = dma.done.wait (%p2457_p2), %s2240_s6, 16  }
 0x3ff   : > { %2607 = vsyncadd (%p2457_p2), %s2240_s6, 4294967280  ;;  %p30_p3 = scmp.ge.s32.totalorder %s2738_s27, 4   ;;  %s3251_s21 = smov %s2614_s22 }
 0x400   : > { %s3252_s22 = smov %s2618_s23  ;;  %s3253_s23 = smov %s2749_s30 }
 0x401   : > { %s3254_s24 = smov %s2738_s27  ;;  %32 = sbr.rel (!%p30_p3) target bundleno = 15 (0xf), region = 143 }
 0x406   :  { %2244 = vsyncpa [#allocation3], 1 }
 0x407   :  { %2246 = vsyncpa [#allocation3 + $0x1], 1 }
 0x408   :  { %2247 = vsyncpa [#allocation5], 1 }
 0x409   :  { %2249 = vsyncpa [#allocation5 + $0x1], 1 }

</bundles_post_ra>
